<compile_context>
chip_gen: v6e
topology: v6e:2x2x1
jax: 0.10.0
libtpu: 0.0.40
codegen_flags: <defaults>
</compile_context>

<pallas_src>
import functools

import jax
import jax.numpy as jnp
from jax.experimental import pallas as pl
from jax.experimental.pallas import tpu as pltpu

K = 5          # kernel size
PAD = 2        # 'same' padding for 5x5
KK = K * K


def _resblock_kernel(mask_ref, x_ref, w1_ref, w2_ref, out_ref, *, W):
    """Fused conv5x5 -> relu -> conv5x5 -> +x -> relu for one block of images.

    mask_ref : (KK*Cpad + 1, L)   f32 0/1 boundary masks; last row is all-ones (bias row)
    x_ref    : (Cpad, L)          activations; lanes = flattened (image, h, w)
    w*_ref   : (Cpad, KK*Cpad+1)  w_aug[co, (ky*K+kx)*Cpad + ci] = w[co, ci, ky, kx];
                                  last column = bias (possibly bf16 for the MXU)
    out_ref  : (Cpad, L)
    """
    Cpad, L = x_ref.shape
    x = x_ref[...].astype(jnp.float32)          # residual kept in f32
    masks = mask_ref[...]                       # (KK*Cpad+1, L), hoisted host-side constant
    ones_row = jnp.ones((1, L), jnp.float32)    # bias row of the patch

    def conv(act, w_ref):
        # act: (Cpad, L) f32  ->  (Cpad, L) f32
        taps = []
        for ky in range(K):
            for kx in range(K):
                s = (ky - PAD) * W + (kx - PAD)      # source lane offset of this tap
                # Want out[:, p] = act[:, (p + s) % L]; pltpu.roll follows the
                # jnp.roll convention (out[i] = in[i - shift]), so shift = -s.
                # The wrap-around is neutralized by the boundary masks below.
                taps.append(act if s == 0 else pltpu.roll(act, shift=(-s) % L, axis=1))
        taps.append(ones_row)
        # 8-aligned sublane concat -> (KK*Cpad+1, L); one multiply zeroes all
        # out-of-image taps (and cross-image leakage of the lane rolls).
        patch = jnp.concatenate(taps, axis=0) * masks
        # Single 25-tap matmul with the bias folded in; f32 accumulation on the MXU.
        return jnp.dot(w_ref[...], patch.astype(w_ref.dtype),
                       preferred_element_type=jnp.float32)

    y = jnp.maximum(conv(x, w1_ref), 0.0)            # relu(conv1(x) + b1)
    z = conv(y, w2_ref)                              # conv2(y) + b2
    out_ref[...] = jnp.maximum(x + z, 0.0).astype(out_ref.dtype)   # relu(x + z)


def _make_masks(H, W, B, Cpad):
    """(KK*Cpad + 1, B*H*W) 0/1 boundary masks matching the patch row layout.

    Positions use lane % (H*W), so one mask array covers every image in a block and
    also kills any cross-image leakage from the lane rolls.  Last row = ones (bias).
    """
    HW = H * W
    L = B * HW
    q = jnp.arange(L) % HW
    row, col = q // W, q % W
    rows = []
    for ky in range(K):
        dy = ky - PAD
        for kx in range(K):
            dx = kx - PAD
            m = ((row + dy >= 0) & (row + dy < H) &
                 (col + dx >= 0) & (col + dx < W)).astype(jnp.float32)   # (L,)
            rows.append(jnp.broadcast_to(m, (Cpad, L)))
    rows.append(jnp.ones((1, L), jnp.float32))
    return jnp.concatenate(rows, axis=0)                                 # (KK*Cpad+1, L)


def _prep_weight(w_oihw, b, Cpad):
    """(Cout,Cin,K,K) + (Cout,) -> (Cpad, KK*Cpad + 1), bias folded into last column."""
    Cout, Cin, KH, KW = w_oihw.shape
    w = jnp.transpose(w_oihw, (0, 2, 3, 1))                      # (Cout, KH, KW, Cin)
    w = jnp.pad(w, ((0, Cpad - Cout), (0, 0), (0, 0), (0, Cpad - Cin)))
    w = w.reshape(Cpad, KH * KW * Cpad)
    b_col = jnp.pad(b, (0, Cpad - Cout)).reshape(Cpad, 1)
    return jnp.concatenate([w, b_col], axis=1)                   # (Cpad, KK*Cpad+1)


def residual_block_m(x_nchw, params, *, mxu_dtype=jnp.float32, num_blocks=None):
    """forward(x) = relu(x + conv2(relu(conv1(x)))) ; x is NCHW like PyTorch.

    mxu_dtype: MXU input precision.  Use jnp.bfloat16 on v6e/v7x (full-rate bf16 MXU,
    f32 accumulation); keep the f32 default on v5e where extra casts cost VALU slots.
    num_blocks: grid steps over the batch.  Default keeps 2 steps when N is even
    (megacore split on v7x); set 1 on v5e/v6e to collapse the batch loop entirely.
    """
    N, C, H, W = x_nchw.shape
    HW = H * W
    Cpad = max(8, -(-C // 8) * 8)                    # sublane-tile aligned channel count
    if num_blocks is None:
        num_blocks = 2 if (N >= 2 and N % 2 == 0) else 1
    assert N % num_blocks == 0, "num_blocks must divide N"
    B = N // num_blocks
    L = B * HW

    # Lane-dense layout: channels on sublanes, (image, h, w) flattened on lanes.
    xf = jnp.transpose(x_nchw, (1, 0, 2, 3)).reshape(C, N * HW)
    xf = jnp.pad(xf, ((0, Cpad - C), (0, 0)))

    masks = _make_masks(H, W, B, Cpad)               # hoisted out of the kernel body
    w1 = params["w1_aug"].astype(mxu_dtype)          # host-side cast: no per-step casts
    w2 = params["w2_aug"].astype(mxu_dtype)

    rows_w = KK * Cpad + 1
    kernel = functools.partial(_resblock_kernel, W=W)
    out = pl.pallas_call(
        kernel,
        out_shape=jax.ShapeDtypeStruct((Cpad, N * HW), x_nchw.dtype),
        grid_spec=pltpu.PrefetchScalarGridSpec(
            num_scalar_prefetch=0,
            grid=(num_blocks,),
            in_specs=[
                pl.BlockSpec((rows_w, L), lambda g: (0, 0)),      # masks (shared)
                pl.BlockSpec((Cpad, L), lambda g: (0, g)),        # x block (B images)
                pl.BlockSpec((Cpad, rows_w), lambda g: (0, 0)),   # w1 (shared)
                pl.BlockSpec((Cpad, rows_w), lambda g: (0, 0)),   # w2 (shared)
            ],
            out_specs=pl.BlockSpec((Cpad, L), lambda g: (0, g)),
        ),
        compiler_params=pltpu.CompilerParams(dimension_semantics=("parallel",)),
    )(masks, xf, w1, w2)
    # TODO(synk): for large H*W add H-strip tiling with a 4-row halo; size strips
    # against v7x's 64 MiB physical / 32 MiB default-scoped VMEM (not v5e/v6e's 128 MiB),
    # or raise vmem_limit_bytes via pltpu.CompilerParams.
    return out[:C].reshape(C, N, H, W).transpose(1, 0, 2, 3)


def init_params(key, channel):
    """Deterministic init mimicking nn.Conv2d default (uniform +/- 1/sqrt(fan_in))."""
    fan_in = channel * K * K
    bound = 1.0 / jnp.sqrt(fan_in)
    Cpad = max(8, -(-channel // 8) * 8)
    k1, k2, k3, k4 = jax.random.split(key, 4)
    w1 = jax.random.uniform(k1, (channel, channel, K, K), jnp.float32, -bound, bound)
    b1 = jax.random.uniform(k2, (channel,), jnp.float32, -bound, bound)
    w2 = jax.random.uniform(k3, (channel, channel, K, K), jnp.float32, -bound, bound)
    b2 = jax.random.uniform(k4, (channel,), jnp.float32, -bound, bound)
    return {
        "w1_aug": _prep_weight(w1, b1, Cpad),
        "w2_aug": _prep_weight(w2, b2, Cpad),
        "w1_oihw": w1, "b1": b1, "w2_oihw": w2, "b2": b2,
    }


def _reference(x_nchw, params):
    """Plain-JAX reference (NCHW, like PyTorch) for a correctness check."""
    def conv(x, w, b):
        y = jax.lax.conv_general_dilated(
            x, w, window_strides=(1, 1), padding="SAME",
            dimension_numbers=("NCHW", "OIHW", "NCHW"))
        return y + b[None, :, None, None]
    y = jax.nn.relu(conv(x_nchw, params["w1_oihw"], params["b1"]))
    y = conv(y, params["w2_oihw"], params["b2"])
    return jax.nn.relu(x_nchw + y)


if __name__ == "__main__":
    channel = 4
    N, H, W = 2, 16, 16
    key = jax.random.PRNGKey(0)
    kx, kp = jax.random.split(key)
    x = jax.random.normal(kx, (N, channel, H, W), jnp.float32)
    params = init_params(kp, channel)

    ref = _reference(x, params)

    # f32 MXU path (bit-for-bit comparable to the f32 reference; safe default on v5e).
    out = jax.block_until_ready(residual_block_m(x, params))
    assert out.shape == ref.shape == (N, channel, H, W)
    assert jnp.allclose(out, ref, atol=1e-4, rtol=1e-4), "f32 kernel mismatch vs reference"

    # bf16 MXU-input path (recommended on v6e/v7x); f32 accumulation, bf16 quantization
    # of the inputs -> loosened tolerance (expected, not a bug).
    out_bf16 = jax.block_until_ready(
        residual_block_m(x, params, mxu_dtype=jnp.bfloat16))
    assert jnp.allclose(out_bf16, ref, atol=1e-1, rtol=1e-1), "bf16 kernel mismatch vs reference"

    print("KERNEL_OK")
</pallas_src>

<mosaic_0001>
module attributes {stable_mosaic.version = 11 : i64} {
  func.func @_resblock_kernel(%arg0: i32, %arg1: memref<201x256xf32, #tpu.memory_space<vmem>>, %arg2: memref<8x256xf32, #tpu.memory_space<vmem>>, %arg3: memref<8x201xf32, #tpu.memory_space<vmem>>, %arg4: memref<8x201xf32, #tpu.memory_space<vmem>>, %arg5: memref<8x256xf32, #tpu.memory_space<vmem>>) attributes {dimension_semantics = [#tpu.dimension_semantics<parallel>], iteration_bounds = array<i64: 2>, scalar_prefetch = 0 : i64, scratch_operands = 0 : i64, tpu.core_type = #tpu.core_type<tc>, window_params = [{pipeline_mode = #tpu.pipeline_mode<synchronous>, transform_indices = @transform_0, window_bounds = array<i64: 201, 256>}, {transform_indices = @transform_1, window_bounds = array<i64: 8, 256>}, {pipeline_mode = #tpu.pipeline_mode<synchronous>, transform_indices = @transform_2, window_bounds = array<i64: 8, 201>}, {pipeline_mode = #tpu.pipeline_mode<synchronous>, transform_indices = @transform_3, window_bounds = array<i64: 8, 201>}, {transform_indices = @transform_4, window_bounds = array<i64: 8, 256>}]} {
    %c0 = arith.constant 0 : index
    %c0_0 = arith.constant 0 : index
    %0 = vector.load %arg2[%c0, %c0_0] : memref<8x256xf32, #tpu.memory_space<vmem>>, vector<8x256xf32>
    %c0_1 = arith.constant 0 : index
    %c0_2 = arith.constant 0 : index
    %1 = vector.load %arg1[%c0_1, %c0_2] : memref<201x256xf32, #tpu.memory_space<vmem>>, vector<201x256xf32>
    %cst = arith.constant 1.000000e+00 : f32
    %2 = vector.broadcast %cst : f32 to vector<1x256xf32>
    %c34_i32 = arith.constant 34 : i32
    %3 = tpu.dynamic_rotate %0 by %c34_i32 dim 1 : vector<8x256xf32>, i32 -> vector<8x256xf32>
    %c33_i32 = arith.constant 33 : i32
    %4 = tpu.dynamic_rotate %0 by %c33_i32 dim 1 : vector<8x256xf32>, i32 -> vector<8x256xf32>
    %c32_i32 = arith.constant 32 : i32
    %5 = tpu.dynamic_rotate %0 by %c32_i32 dim 1 : vector<8x256xf32>, i32 -> vector<8x256xf32>
    %c31_i32 = arith.constant 31 : i32
    %6 = tpu.dynamic_rotate %0 by %c31_i32 dim 1 : vector<8x256xf32>, i32 -> vector<8x256xf32>
    %c30_i32 = arith.constant 30 : i32
    %7 = tpu.dynamic_rotate %0 by %c30_i32 dim 1 : vector<8x256xf32>, i32 -> vector<8x256xf32>
    %c18_i32 = arith.constant 18 : i32
    %8 = tpu.dynamic_rotate %0 by %c18_i32 dim 1 : vector<8x256xf32>, i32 -> vector<8x256xf32>
    %c17_i32 = arith.constant 17 : i32
    %9 = tpu.dynamic_rotate %0 by %c17_i32 dim 1 : vector<8x256xf32>, i32 -> vector<8x256xf32>
    %c16_i32 = arith.constant 16 : i32
    %10 = tpu.dynamic_rotate %0 by %c16_i32 dim 1 : vector<8x256xf32>, i32 -> vector<8x256xf32>
    %c15_i32 = arith.constant 15 : i32
    %11 = tpu.dynamic_rotate %0 by %c15_i32 dim 1 : vector<8x256xf32>, i32 -> vector<8x256xf32>
    %c14_i32 = arith.constant 14 : i32
    %12 = tpu.dynamic_rotate %0 by %c14_i32 dim 1 : vector<8x256xf32>, i32 -> vector<8x256xf32>
    %c2_i32 = arith.constant 2 : i32
    %13 = tpu.dynamic_rotate %0 by %c2_i32 dim 1 : vector<8x256xf32>, i32 -> vector<8x256xf32>
    %c1_i32 = arith.constant 1 : i32
    %14 = tpu.dynamic_rotate %0 by %c1_i32 dim 1 : vector<8x256xf32>, i32 -> vector<8x256xf32>
    %c255_i32 = arith.constant 255 : i32
    %15 = tpu.dynamic_rotate %0 by %c255_i32 dim 1 : vector<8x256xf32>, i32 -> vector<8x256xf32>
    %c254_i32 = arith.constant 254 : i32
    %16 = tpu.dynamic_rotate %0 by %c254_i32 dim 1 : vector<8x256xf32>, i32 -> vector<8x256xf32>
    %c242_i32 = arith.constant 242 : i32
    %17 = tpu.dynamic_rotate %0 by %c242_i32 dim 1 : vector<8x256xf32>, i32 -> vector<8x256xf32>
    %c241_i32 = arith.constant 241 : i32
    %18 = tpu.dynamic_rotate %0 by %c241_i32 dim 1 : vector<8x256xf32>, i32 -> vector<8x256xf32>
    %c240_i32 = arith.constant 240 : i32
    %19 = tpu.dynamic_rotate %0 by %c240_i32 dim 1 : vector<8x256xf32>, i32 -> vector<8x256xf32>
    %c239_i32 = arith.constant 239 : i32
    %20 = tpu.dynamic_rotate %0 by %c239_i32 dim 1 : vector<8x256xf32>, i32 -> vector<8x256xf32>
    %c238_i32 = arith.constant 238 : i32
    %21 = tpu.dynamic_rotate %0 by %c238_i32 dim 1 : vector<8x256xf32>, i32 -> vector<8x256xf32>
    %c226_i32 = arith.constant 226 : i32
    %22 = tpu.dynamic_rotate %0 by %c226_i32 dim 1 : vector<8x256xf32>, i32 -> vector<8x256xf32>
    %c225_i32 = arith.constant 225 : i32
    %23 = tpu.dynamic_rotate %0 by %c225_i32 dim 1 : vector<8x256xf32>, i32 -> vector<8x256xf32>
    %c224_i32 = arith.constant 224 : i32
    %24 = tpu.dynamic_rotate %0 by %c224_i32 dim 1 : vector<8x256xf32>, i32 -> vector<8x256xf32>
    %c223_i32 = arith.constant 223 : i32
    %25 = tpu.dynamic_rotate %0 by %c223_i32 dim 1 : vector<8x256xf32>, i32 -> vector<8x256xf32>
    %c222_i32 = arith.constant 222 : i32
    %26 = tpu.dynamic_rotate %0 by %c222_i32 dim 1 : vector<8x256xf32>, i32 -> vector<8x256xf32>
    %27 = tpu.concatenate %3, %4, %5, %6, %7, %8, %9, %10, %11, %12, %13, %14, %0, %15, %16, %17 in 0 : vector<8x256xf32>, vector<8x256xf32>, vector<8x256xf32>, vector<8x256xf32>, vector<8x256xf32>, vector<8x256xf32>, vector<8x256xf32>, vector<8x256xf32>, vector<8x256xf32>, vector<8x256xf32>, vector<8x256xf32>, vector<8x256xf32>, vector<8x256xf32>, vector<8x256xf32>, vector<8x256xf32>, vector<8x256xf32> -> vector<128x256xf32>
    %28 = tpu.concatenate %18, %19, %20, %21, %22, %23, %24, %25, %26, %2 in 0 : vector<8x256xf32>, vector<8x256xf32>, vector<8x256xf32>, vector<8x256xf32>, vector<8x256xf32>, vector<8x256xf32>, vector<8x256xf32>, vector<8x256xf32>, vector<8x256xf32>, vector<1x256xf32> -> vector<73x256xf32>
    %29 = tpu.concatenate %27, %28 in 0 : vector<128x256xf32>, vector<73x256xf32> -> vector<201x256xf32>
    %30 = arith.mulf %29, %1 : vector<201x256xf32>
    %c0_3 = arith.constant 0 : index
    %c0_4 = arith.constant 0 : index
    %31 = vector.load %arg3[%c0_3, %c0_4] : memref<8x201xf32, #tpu.memory_space<vmem>>, vector<8x201xf32>
    %cst_5 = arith.constant dense<0.000000e+00> : vector<8x256xf32>
    %32 = tpu.matmul %31, %30, %cst_5 {dimension_numbers = #tpu.dot_dimension_numbers<[1], [0], [0], [1], [0, 0, 1, 1], [], []>} : vector<8x201xf32>, vector<201x256xf32>, vector<8x256xf32> -> vector<8x256xf32>
    %cst_6 = arith.constant 0.000000e+00 : f32
    %33 = vector.broadcast %cst_6 : f32 to vector<8x256xf32>
    %34 = arith.maximumf %32, %33 : vector<8x256xf32>
    %c34_i32_7 = arith.constant 34 : i32
    %35 = tpu.dynamic_rotate %34 by %c34_i32_7 dim 1 : vector<8x256xf32>, i32 -> vector<8x256xf32>
    %c33_i32_8 = arith.constant 33 : i32
    %36 = tpu.dynamic_rotate %34 by %c33_i32_8 dim 1 : vector<8x256xf32>, i32 -> vector<8x256xf32>
    %c32_i32_9 = arith.constant 32 : i32
    %37 = tpu.dynamic_rotate %34 by %c32_i32_9 dim 1 : vector<8x256xf32>, i32 -> vector<8x256xf32>
    %c31_i32_10 = arith.constant 31 : i32
    %38 = tpu.dynamic_rotate %34 by %c31_i32_10 dim 1 : vector<8x256xf32>, i32 -> vector<8x256xf32>
    %c30_i32_11 = arith.constant 30 : i32
    %39 = tpu.dynamic_rotate %34 by %c30_i32_11 dim 1 : vector<8x256xf32>, i32 -> vector<8x256xf32>
    %c18_i32_12 = arith.constant 18 : i32
    %40 = tpu.dynamic_rotate %34 by %c18_i32_12 dim 1 : vector<8x256xf32>, i32 -> vector<8x256xf32>
    %c17_i32_13 = arith.constant 17 : i32
    %41 = tpu.dynamic_rotate %34 by %c17_i32_13 dim 1 : vector<8x256xf32>, i32 -> vector<8x256xf32>
    %c16_i32_14 = arith.constant 16 : i32
    %42 = tpu.dynamic_rotate %34 by %c16_i32_14 dim 1 : vector<8x256xf32>, i32 -> vector<8x256xf32>
    %c15_i32_15 = arith.constant 15 : i32
    %43 = tpu.dynamic_rotate %34 by %c15_i32_15 dim 1 : vector<8x256xf32>, i32 -> vector<8x256xf32>
    %c14_i32_16 = arith.constant 14 : i32
    %44 = tpu.dynamic_rotate %34 by %c14_i32_16 dim 1 : vector<8x256xf32>, i32 -> vector<8x256xf32>
    %c2_i32_17 = arith.constant 2 : i32
    %45 = tpu.dynamic_rotate %34 by %c2_i32_17 dim 1 : vector<8x256xf32>, i32 -> vector<8x256xf32>
    %c1_i32_18 = arith.constant 1 : i32
    %46 = tpu.dynamic_rotate %34 by %c1_i32_18 dim 1 : vector<8x256xf32>, i32 -> vector<8x256xf32>
    %c255_i32_19 = arith.constant 255 : i32
    %47 = tpu.dynamic_rotate %34 by %c255_i32_19 dim 1 : vector<8x256xf32>, i32 -> vector<8x256xf32>
    %c254_i32_20 = arith.constant 254 : i32
    %48 = tpu.dynamic_rotate %34 by %c254_i32_20 dim 1 : vector<8x256xf32>, i32 -> vector<8x256xf32>
    %c242_i32_21 = arith.constant 242 : i32
    %49 = tpu.dynamic_rotate %34 by %c242_i32_21 dim 1 : vector<8x256xf32>, i32 -> vector<8x256xf32>
    %c241_i32_22 = arith.constant 241 : i32
    %50 = tpu.dynamic_rotate %34 by %c241_i32_22 dim 1 : vector<8x256xf32>, i32 -> vector<8x256xf32>
    %c240_i32_23 = arith.constant 240 : i32
    %51 = tpu.dynamic_rotate %34 by %c240_i32_23 dim 1 : vector<8x256xf32>, i32 -> vector<8x256xf32>
    %c239_i32_24 = arith.constant 239 : i32
    %52 = tpu.dynamic_rotate %34 by %c239_i32_24 dim 1 : vector<8x256xf32>, i32 -> vector<8x256xf32>
    %c238_i32_25 = arith.constant 238 : i32
    %53 = tpu.dynamic_rotate %34 by %c238_i32_25 dim 1 : vector<8x256xf32>, i32 -> vector<8x256xf32>
    %c226_i32_26 = arith.constant 226 : i32
    %54 = tpu.dynamic_rotate %34 by %c226_i32_26 dim 1 : vector<8x256xf32>, i32 -> vector<8x256xf32>
    %c225_i32_27 = arith.constant 225 : i32
    %55 = tpu.dynamic_rotate %34 by %c225_i32_27 dim 1 : vector<8x256xf32>, i32 -> vector<8x256xf32>
    %c224_i32_28 = arith.constant 224 : i32
    %56 = tpu.dynamic_rotate %34 by %c224_i32_28 dim 1 : vector<8x256xf32>, i32 -> vector<8x256xf32>
    %c223_i32_29 = arith.constant 223 : i32
    %57 = tpu.dynamic_rotate %34 by %c223_i32_29 dim 1 : vector<8x256xf32>, i32 -> vector<8x256xf32>
    %c222_i32_30 = arith.constant 222 : i32
    %58 = tpu.dynamic_rotate %34 by %c222_i32_30 dim 1 : vector<8x256xf32>, i32 -> vector<8x256xf32>
    %59 = tpu.concatenate %35, %36, %37, %38, %39, %40, %41, %42, %43, %44, %45, %46, %34, %47, %48, %49 in 0 : vector<8x256xf32>, vector<8x256xf32>, vector<8x256xf32>, vector<8x256xf32>, vector<8x256xf32>, vector<8x256xf32>, vector<8x256xf32>, vector<8x256xf32>, vector<8x256xf32>, vector<8x256xf32>, vector<8x256xf32>, vector<8x256xf32>, vector<8x256xf32>, vector<8x256xf32>, vector<8x256xf32>, vector<8x256xf32> -> vector<128x256xf32>
    %60 = tpu.concatenate %50, %51, %52, %53, %54, %55, %56, %57, %58, %2 in 0 : vector<8x256xf32>, vector<8x256xf32>, vector<8x256xf32>, vector<8x256xf32>, vector<8x256xf32>, vector<8x256xf32>, vector<8x256xf32>, vector<8x256xf32>, vector<8x256xf32>, vector<1x256xf32> -> vector<73x256xf32>
    %61 = tpu.concatenate %59, %60 in 0 : vector<128x256xf32>, vector<73x256xf32> -> vector<201x256xf32>
    %62 = arith.mulf %61, %1 : vector<201x256xf32>
    %c0_31 = arith.constant 0 : index
    %c0_32 = arith.constant 0 : index
    %63 = vector.load %arg4[%c0_31, %c0_32] : memref<8x201xf32, #tpu.memory_space<vmem>>, vector<8x201xf32>
    %cst_33 = arith.constant dense<0.000000e+00> : vector<8x256xf32>
    %64 = tpu.matmul %63, %62, %cst_33 {dimension_numbers = #tpu.dot_dimension_numbers<[1], [0], [0], [1], [0, 0, 1, 1], [], []>} : vector<8x201xf32>, vector<201x256xf32>, vector<8x256xf32> -> vector<8x256xf32>
    %65 = arith.addf %0, %64 : vector<8x256xf32>
    %cst_34 = arith.constant 0.000000e+00 : f32
    %66 = vector.broadcast %cst_34 : f32 to vector<8x256xf32>
    %67 = arith.maximumf %65, %66 : vector<8x256xf32>
    %c0_35 = arith.constant 0 : index
    %c0_36 = arith.constant 0 : index
    %68 = vector.load %arg5[%c0_35, %c0_36] : memref<8x256xf32, #tpu.memory_space<vmem>>, vector<8x256xf32>
    tpu.vector_store %arg5[%c0_35, %c0_36], %67 {strides = array<i32>} : memref<8x256xf32, #tpu.memory_space<vmem>>, vector<8x256xf32>,
    return
  }
  func.func @transform_0(%arg0: i32) -> (i32, i32) {
    %c0_i32 = arith.constant 0 : i32
    %c0_i32_0 = arith.constant 0 : i32
    %c0_i32_1 = arith.constant 0 : i32
    return %c0_i32, %c0_i32_0 : i32, i32
  }
  func.func @transform_1(%arg0: i32) -> (i32, i32) {
    %c0_i32 = arith.constant 0 : i32
    %c0_i32_0 = arith.constant 0 : i32
    return %c0_i32, %arg0 : i32, i32
  }
  func.func @transform_2(%arg0: i32) -> (i32, i32) {
    %c0_i32 = arith.constant 0 : i32
    %c0_i32_0 = arith.constant 0 : i32
    %c0_i32_1 = arith.constant 0 : i32
    return %c0_i32, %c0_i32_0 : i32, i32
  }
  func.func @transform_3(%arg0: i32) -> (i32, i32) {
    %c0_i32 = arith.constant 0 : i32
    %c0_i32_0 = arith.constant 0 : i32
    %c0_i32_1 = arith.constant 0 : i32
    return %c0_i32, %c0_i32_0 : i32, i32
  }
  func.func @transform_4(%arg0: i32) -> (i32, i32) {
    %c0_i32 = arith.constant 0 : i32
    %c0_i32_0 = arith.constant 0 : i32
    return %c0_i32, %arg0 : i32, i32
  }
}

</mosaic_0001>

<bundles_post_ra>
// kernel: tpu_custom_call.1
= control target key start
LH: loop header
LB: loop body
LE: loop exit
PB: predicated region body
PF: predicated region fallthrough
CT: control target
= control target key end

     0   :  { %9 = vsyncpa [#allocation3], 0  ;;  %s2209_s0 = inlined_call_operand.hbm [shape: f32[201,256], index: 0, kind: input, shape index: {}]   ;;  %s2210_s1 = inlined_call_operand.hbm [shape: f32[8,512], index: 1, kind: input, shape index: {}]   ;;  %s2211_s2 = inlined_call_operand.hbm [shape: f32[8,201], index: 2, kind: input, shape index: {}]   ;;  %s2212_s3 = inlined_call_operand.hbm [shape: f32[8,201], index: 3, kind: input, shape index: {}]   ;;  %s2213_s4 = inlined_call_operand.hbm [shape: f32[8,512], index: 4, kind: output, shape index: {}]  }
   0x1   :  { %10 = vsyncpa [#allocation6], 0 }
   0x2   :  { %12 = vsyncpa [#allocation6 + $0x1], 0 }
   0x3   :  { %13 = vsyncpa [#allocation9], 0 }
   0x4   :  { %14 = vsyncpa [#allocation4], 0 }
   0x5   :  { %16 = vsyncpa [#allocation4 + $0x1], 0  ;;  %s1381_s15 = smov 0   ;;  %s1383_s16 = smov 0  }
   0x6   :  { %s1385_s17 = smov 0   ;;  %s1387_s18 = smov 0  }
   0x7 LB: > { %s1402_s19 = sadd.s32 4294967295, %s1323_s18   ;;  %s1008_s20 = sadd.s32 4294967294, %s1323_s18   ;;  %s1323_s18 = sphi %s1387_s18, %s2310_s18   ;;  %s1319_s17 = sphi %s1385_s17, %s2309_s17   ;;  %s1315_s16 = sphi %s1383_s16, %s2308_s16   ;;  %s1311_s15 = sphi %s1381_s15, %s2307_s15  }
   0x8   : > { %p63_p0 = scmp.ne.s32.totalorder %s1315_s16, %s1311_s15  ;;  %p2214_p1 = scmp.eq.s32.totalorder %s1402_s19, 0 }
   0x9   : > { %p135_p3 = scmp.eq.s32.totalorder %s1008_s20, 1  ;;  %p1009_p5 = scmp.ge.s32.totalorder %s1323_s18, 1 }
   0xa   : > { %p1411_p4 = por %p2214_p1, %p63_p0  ;;  %p142_p7 = scmp.lt.s32.totalorder %s1323_s18, 3 }
   0xb   : > { %p1416_p6 = por %p135_p3, %p63_p0  ;;  %s1325_s24 = smov [#allocation7]  }
   0xc   : > { %s2251_s21 = scalar_select %p1411_p4, 1, 0 }
   0xd   : > { %s2252_s22 = scalar_select %p1416_p6, 1, 0 }
   0xe   : > { %p1421_p8 = pnand %p1009_p5, %p142_p7  ;;  %s168_s25 = sshll.u32 %s1325_s24, 4  ;;  %s169_s25 = int_to_ptr.vmem [resolvable:$true] %s168_s25 }
   0xf   : > { %s1326_s26 = smov [#allocation2]   ;;  %s1327_s29 = smov [#allocation8]  }
  0x10   : > { %s2253_s23 = scalar_select %p1421_p8, 1, 0 }
  0x11   : > { %p1052_p10 = pneg %p1421_p8  ;;  %s154_s27 = sshll.u32 %s1326_s26, 4  ;;  %s155_s27 = int_to_ptr.vmem [resolvable:$true] %s154_s27 }
  0x12   : > { %s179_s30 = sshll.u32 %s1327_s29, 4  ;;  %s1152_s5 = scalar_lea.vmem %s169_s25, 256  ;;  %s180_s30 = int_to_ptr.vmem [resolvable:$true] %s179_s30 }
  0x13   : > { %p1430_p11 = pnand %p1052_p10, %p2214_p1  ;;  %p1153_p13 = scmp.ne.s32.totalorder %s169_s25, %s1152_s5 }
  0x14   : > { %p1160_p5 = scmp.lt.s32.totalorder %s169_s25, %s169_s25  ;;  %p1161_p7 = scmp.lt.s32.totalorder %s1152_s5, %s1152_s5 }
  0x15   : > { %p1143_p12 = pneg %p1430_p11 }
  0x16   : > { %p1162_p9 = por %p1161_p7, %p1160_p5 }
  0x17   : > { %p1155_p0 = pnand %p1153_p13, %p1143_p12 }
  0x19   : > { %p1156_p3 = pneg %p1155_p0 }
  0x1b   : > { %p1163_p10 = pnand %p1162_p9, %p1156_p3 }
  0x1d   : > { %1166 = shalt.err (!%p1163_p10)
}
  0x1e   : > { %1058 = dma.hbm_to_vmem [thread:$0]  (!%p1430_p11), %s2211_s2, 256, %s169_s25, [#allocation6]  }
  0x1f   : > { %s1178_s8 = scalar_lea.vmem %s155_s27, 6656  ;;  %p1186_p13 = scmp.lt.s32.totalorder %s155_s27, %s155_s27 }
  0x20   : > { %p1179_p1 = scmp.ne.s32.totalorder %s155_s27, %s1178_s8  ;;  %p1187_p0 = scmp.lt.s32.totalorder %s1178_s8, %s1178_s8 }
  0x22   : > { %p1181_p2 = pnand %p1179_p1, %p1143_p12  ;;  %p1188_p4 = por %p1187_p0, %p1186_p13 }
  0x24   : > { %p1182_p6 = pneg %p1181_p2 }
  0x26   : > { %p1189_p8 = pnand %p1188_p4, %p1182_p6 }
  0x28   : > { %1192 = shalt.err (!%p1189_p8)
}
  0x29   : > { %s1328_s9 = smov 256   ;;  %s1329_s10 = smov 16  }
  0x2a   : > { %1055 = dma.hbm_to_vmem [thread:$0]  (!%p1430_p11), %s2209_s0, 6656, %s155_s27, [#allocation3], %s1328_s9, %s1328_s9, %s1329_s10  }
  0x2b   : > { %s1204_s13 = scalar_lea.vmem %s180_s30, 256  ;;  %p1212_p3 = scmp.lt.s32.totalorder %s180_s30, %s180_s30 }
  0x2c   : > { %p1205_p9 = scmp.ne.s32.totalorder %s180_s30, %s1204_s13  ;;  %p1213_p5 = scmp.lt.s32.totalorder %s1204_s13, %s1204_s13 }
  0x2e   : > { %p1207_p1 = pnand %p1205_p9, %p1143_p12  ;;  %p1214_p4 = por %p1213_p5, %p1212_p3 }
  0x30   : > { %p1208_p2 = pneg %p1207_p1 }
  0x32   : > { %p1215_p6 = pnand %p1214_p4, %p1208_p2 }
  0x34   : > { %1218 = shalt.err (!%p1215_p6)
}
  0x35   : > { %1061 = dma.hbm_to_vmem [thread:$0]  (!%p1430_p11), %s2212_s3, 256, %s180_s30, [#allocation9]  }
  0x36   : > { %s1461_s24 = sadd.s32 1, %s1323_s18   ;;  %s50_s26 = sadd.s32 1, %s1319_s17 }
  0x37   : > { %s47_s25 = ssub.s32 %s1323_s18, %s1461_s24  ;;  %p57_p12 = scmp.ne.s32.totalorder %s1319_s17, %s1315_s16 }
  0x38   : > { %p48_p8 = scmp.eq.s32.totalorder %s47_s25, 0  ;;  %p58_p7 = scmp.eq.s32.totalorder %s1323_s18, 0 }
  0x39   : > { %p1073_p10 = scmp.lt.s32.totalorder %s1323_s18, 2  ;;  %p2255_p0 = scmp.eq.s32.totalorder %s1402_s19, 1 }
  0x3a   : > { %s1471_s27 = scalar_select %p48_p8, %s1319_s17, %s50_s26  }
  0x3b   : > { %p59_p13 = por %p58_p7, %p57_p12  ;;  %p1475_p9 = por %p2255_p0, %p57_p12 }
  0x3c   : > { %s190_s29 = sand.u32 1, %s1323_s18   ;;  %s192_s5 = sand.u32 1, %s1319_s17  }
  0x3d   : > { %s2256_s28 = scalar_select %p1475_p9, 1, 0 }
  0x3e   : > { %s1014_s30 = sshll.u32 %s192_s5, 4  ;;  %s1034_s6 = sshll.u32 %s1323_s18, 8 }
  0x3f   : > { %s1485_s9 = scalar_lea.hbm %s2210_s1, %s1034_s6  ;;  %s194_s10 = scalar_lea.vmem [#allocation5], %s1014_s30 }
  0x40   : > { %s202_s11 = sshll.u32 %s194_s10, 4  ;;  %p1487_p11 = pnand %p1073_p10, %p59_p13  ;;  %s203_s11 = int_to_ptr.vmem [resolvable:$true] %s202_s11 }
  0x41   : > { %s191_s13 = scalar_lea.sflag [#allocation6], %s190_s29  ;;  %s1219_s14 = scalar_lea.hbm %s1485_s9, 256 }
  0x42   : > { %p1220_p1 = scmp.ne.s32.totalorder %s1485_s9, %s1219_s14  ;;  %p1221_p2 = pneg %p1487_p11 }
  0x43   : > { %s1224_s26 = scalar_lea.hbm %s2210_s1, 512  ;;  %p1225_p4 = scmp.lt.s32.totalorder %s1485_s9, %s2210_s1 }
  0x44   : > { %p1222_p3 = pnand %p1221_p2, %p1220_p1  ;;  %p1226_p6 = scmp.lt.s32.totalorder %s1224_s26, %s1219_s14 }
  0x46   : > { %p1223_p5 = pneg %p1222_p3  ;;  %p1227_p8 = por %p1226_p6, %p1225_p4 }
  0x48   : > { %p1228_p12 = pnand %p1227_p8, %p1223_p5 }
  0x4a   : > { %1231 = shalt.err (!%p1228_p12)
}
  0x4b   : > { %s1232_s6 = scalar_lea.vmem %s203_s11, 256  ;;  %s1330_s29 = smov [#allocation5]  }
  0x4c   : > { %p1233_p7 = scmp.ne.s32.totalorder %s203_s11, %s1232_s6  ;;  %s1237_s7 = sshll.u32 %s1330_s29, 4  ;;  %s1238_s7 = int_to_ptr.vmem [resolvable:$false] %s1237_s7 }
  0x4d   : > { %s1239_s8 = scalar_lea.vmem %s1238_s7, 512  ;;  %p1240_p0 = scmp.lt.s32.totalorder %s203_s11, %s1238_s7 }
  0x4e   : > { %p1235_p10 = pnand %p1233_p7, %p1221_p2  ;;  %p1241_p1 = scmp.lt.s32.totalorder %s1239_s8, %s1232_s6 }
  0x50   : > { %p1236_p13 = pneg %p1235_p10  ;;  %p1242_p3 = por %p1241_p1, %p1240_p0 }
  0x52   : > { %p1243_p9 = pnand %p1242_p3, %p1236_p13 }
  0x54   : > { %1246 = shalt.err (!%p1243_p9)
}
  0x55   : > { %1065 = dma.hbm_to_vmem [thread:$0]  (!%p1487_p11), %s1485_s9, 256, %s203_s11, %s191_s13  }
  0x56   : > { %p2258_p5 = scmp.ne.s32.totalorder %s2253_s23, 0 }
  0x58   : > { %211 = sbr.rel (%p2258_p5) target bundleno = 941 (0x3ad), region = 36 }
  0x5d   : > { %p2259_p4 = scmp.eq.s32.totalorder %s1402_s19, 0 }
  0x5f   : > { %1290 = dma.done.wait (%p2259_p4), [#allocation3], 6656   ;;  %p2260_p2 = pmov %p2259_p4 }
  0x60   : > { %s217_s10 = sand.u32 1, %s1402_s19   ;;  %s2218_s14 = sand.u32 1, %s1315_s16  }
  0x61   : > { %1292 = vsyncadd (%p2260_p2), [#allocation3], 4294960640  ;;  %s1515_s20 = sshll.u32 %s2218_s14, 4  ;;  %s218_s9 = scalar_lea.sflag [#allocation6], %s217_s10 }
  0x62   : > { %s1518_s11 = scalar_lea.vmem [#allocation5], %s1515_s20  ;;  %p2261_p9 = scmp.ne.s32.totalorder %s2251_s21, 0 }
  0x64   : > { %1294 = dma.done.wait (%p2261_p9), %s218_s9, 256  }
  0x65   : > { %1296 = vsyncadd (%p2261_p9), %s218_s9, 4294967040  ;;  %p2262_p11 = pmov %p2260_p2 }
  0x66   : > { %p2263_p6 = pmov %p2260_p2 }
  0x67   : > { %1298 = dma.done.wait (%p2262_p11), [#allocation6], 256  }
  0x68   : > { %1300 = vsyncadd (%p2263_p6), [#allocation6], 4294967040  ;;  %p2264_p8 = pmov %p2260_p2 }
  0x69   : > { %p2265_p12 = pmov %p2260_p2 }
  0x6a   : > { %1302 = dma.done.wait (%p2264_p8), [#allocation9], 256  }
  0x6b   : > { %1304 = vsyncadd (%p2265_p12), [#allocation9], 4294967040  ;;  %v1533_v0 = vld [vmem:[%s1518_s11] sm:$0xff]  ;;  %s1331_s23 = smov 126   ;;  %s1332_s21 = smov 114   ;;  %v1540_v1 = vld [vmem:[%s1518_s11 + $0x8] sm:$0xff]  ;;  %v314_v3 = vlaneseq }
  0x6c   : > { %403 = vrot.lane.b32.xlu1 %v1533_v0, %s1331_s23  ;;  %410 = vrot.lane.b32.xlu0 %v1533_v0, %s1332_s21  ;;  %s1333_s12 = smov 127   ;;  %s1334_s13 = smov 1   ;;  %v531_v2 = vld [vmem:[#allocation7 + $0x8] sm:$0xff]  ;;  %vm532_vm0 = vcmask 596992   ;;  %v1639_v7 = vld [vmem:[#allocation2 + $0xf8] sm:$0xff]  ;;  %v1641_v8 = vld [vmem:[#allocation2 + $0xf0] sm:$0xff] }
  0x6d   : > { %s1335_s25 = smov 2   ;;  %s1336_s26 = smov 14   ;;  %1025 = vmatprep.mubr.msk.f32.mxu0 %vm532_vm0, %v531_v2  ;;  %v1635_v4 = vand.u32 127, %v314_v3  ;;  %v1643_v11 = vld [vmem:[#allocation2 + $0xe8] sm:$0xff]  ;;  %v1651_v15 = vld [vmem:[#allocation2 + $0xe0] sm:$0xff]  ;;  %v1658_v19 = vld [vmem:[#allocation2 + $0xd0] sm:$0xff] }
  0x6e   : > { %s1337_s5 = smov 15   ;;  %s1338_s30 = smov 16   ;;  %v1660_v20 = vld [vmem:[#allocation2 + $0xd8] sm:$0xff]  ;;  %v1662_v21 = vld [vmem:[#allocation2 + $0xc8] sm:$0xff]  ;;  %v1665_v25 = vld [vmem:[#allocation2 + $0xc0] sm:$0xff] }
  0x6f   : > { %s1339_s6 = smov 17   ;;  %s1340_s29 = smov 18   ;;  %vm407_vm1 = vcmp.lt.s32.totalorder %v1635_v4, 126  ;;  %vm414_vm2 = vcmp.lt.s32.totalorder %v1635_v4, 114  ;;  %vm400_vm3 = vcmp.lt.s32.totalorder %v1635_v4, 127  ;;  %vm393_vm4 = vcmp.lt.s32.totalorder %v1635_v4, 1 }
  0x70   : > { %405 = vrot.lane.b32.xlu1 %v1540_v1, %s1331_s23  ;;  %412 = vrot.lane.b32.xlu0 %v1540_v1, %s1332_s21  ;;  %s1341_s7 = smov 30   ;;  %s2219_s8 = smov 31   ;;  %v505_v31 = vmul.f32 %v1662_v21, %v1540_v1  ;;  %v1677_v32 = vld [vmem:[#allocation2 + $0xb0] sm:$0xff]  ;;  %v1679_v33 = vld [vmem:[#allocation2 + $0xb8] sm:$0xff]  ;;  %v504_v34 = vmul.f32 %v1665_v25, %v1533_v0  ;;  %vm386_vm5 = vcmp.lt.s32.totalorder %v1635_v4, 2  ;;  %v1690_v41 = vld [vmem:[#allocation2 + $0xa0] sm:$0xff] }
  0x71   : > { %s2221_s10 = smov 32   ;;  %s2223_s9 = smov 33   ;;  %v1692_v42 = vld [vmem:[#allocation2 + $0xa8] sm:$0xff]  ;;  %vm379_vm6 = vcmp.lt.s32.totalorder %v1635_v4, 14  ;;  %v1701_v49 = vld [vmem:[#allocation2 + $0x90] sm:$0xff]  ;;  %v1703_v50 = vld [vmem:[#allocation2 + $0x98] sm:$0xff] }
  0x72   : > { %s2225_s14 = smov 34   ;;  %vm372_vm7 = vcmp.lt.s32.totalorder %v1635_v4, 15  ;;  %v1712_v57 = vld [vmem:[#allocation2 + $0x80] sm:$0xff]  ;;  %v1714_v58 = vld [vmem:[#allocation2 + $0x88] sm:$0xff]  ;;  %vm365_vm8 = vcmp.lt.s32.totalorder %v1635_v4, 16  ;;  %v1725_v2 = vld [vmem:[#allocation2 + $0x78] sm:$0xff] }
  0x73   : > { %vm358_vm9 = vcmp.lt.s32.totalorder %v1635_v4, 17  ;;  %vm351_vm10 = vcmp.lt.s32.totalorder %v1635_v4, 18  ;;  %vm344_vm11 = vcmp.lt.s32.totalorder %v1635_v4, 30  ;;  %vm337_vm12 = vcmp.lt.s32.totalorder %v1635_v4, 31  ;;  %p2304_p10 = scmp.ne.s32.totalorder %s2256_s28, 0 }
  0x74   : > { %398 = vrot.lane.b32.xlu1 %v1540_v1, %s1333_s12  ;;  %396 = vrot.lane.b32.xlu0 %v1533_v0, %s1333_s12  ;;  %vm2238_vm13 = vcmp.lt.s32.totalorder %v1635_v4, 32  ;;  %vm2237_vm14 = vcmp.lt.s32.totalorder %v1635_v4, 33  ;;  %vm2239_vm15 = vcmp.lt.s32.totalorder %v1635_v4, 34 }
  0x78   : > { %391 = vrot.lane.b32.xlu1 %v1540_v1, %s1334_s13  ;;  %389 = vrot.lane.b32.xlu0 %v1533_v0, %s1334_s13 }
  0x7c   : > { %384 = vrot.lane.b32.xlu1 %v1540_v1, %s1335_s25  ;;  %382 = vrot.lane.b32.xlu0 %v1533_v0, %s1335_s25 }
  0x80   : > { %377 = vrot.lane.b32.xlu1 %v1540_v1, %s1336_s26  ;;  %375 = vrot.lane.b32.xlu0 %v1533_v0, %s1336_s26 }
  0x84   : > { %370 = vrot.lane.b32.xlu1 %v1540_v1, %s1337_s5  ;;  %368 = vrot.lane.b32.xlu0 %v1533_v0, %s1337_s5 }
  0x88   : > { %363 = vrot.lane.b32.xlu1 %v1540_v1, %s1338_s30  ;;  %361 = vrot.lane.b32.xlu0 %v1533_v0, %s1338_s30 }
  0x8c   : > { %356 = vrot.lane.b32.xlu1 %v1540_v1, %s1339_s6  ;;  %354 = vrot.lane.b32.xlu0 %v1533_v0, %s1339_s6 }
  0x90   : > { %349 = vrot.lane.b32.xlu1 %v1540_v1, %s1340_s29  ;;  %347 = vrot.lane.b32.xlu0 %v1533_v0, %s1340_s29 }
  0x94   : > { %342 = vrot.lane.b32.xlu1 %v1540_v1, %s1341_s7  ;;  %340 = vrot.lane.b32.xlu0 %v1533_v0, %s1341_s7 }
  0x98   : > { %335 = vrot.lane.b32.xlu1 %v1540_v1, %s2219_s8  ;;  %333 = vrot.lane.b32.xlu0 %v1533_v0, %s2219_s8  ;;  %s2227_s8 = smov 94  }
  0x9c   : > { %328 = vrot.lane.b32.xlu1 %v1540_v1, %s2221_s10  ;;  %326 = vrot.lane.b32.xlu0 %v1533_v0, %s2221_s10  ;;  %s2229_s10 = smov 95  }
  0xa0   : > { %321 = vrot.lane.b32.xlu1 %v1540_v1, %s2223_s9  ;;  %319 = vrot.lane.b32.xlu0 %v1533_v0, %s2223_s9  ;;  %s2231_s9 = smov 96  }
  0xa4   : > { %312 = vrot.lane.b32.xlu1 %v1540_v1, %s2225_s14  ;;  %310 = vrot.lane.b32.xlu0 %v1533_v0, %s2225_s14  ;;  %s2233_s14 = smov 97  }
  0xa8   : > { %475 = vrot.lane.b32.xlu1 %v1540_v1, %s2227_s8  ;;  %473 = vrot.lane.b32.xlu0 %v1533_v0, %s2227_s8  ;;  %s2235_s8 = smov 98  }
  0xac   : > { %468 = vrot.lane.b32.xlu1 %v1540_v1, %s2229_s10  ;;  %466 = vrot.lane.b32.xlu0 %v1533_v0, %s2229_s10  ;;  %s1351_s10 = smov 110  }
  0xb0   : > { %461 = vrot.lane.b32.xlu1 %v1540_v1, %s2231_s9  ;;  %459 = vrot.lane.b32.xlu0 %v1533_v0, %s2231_s9  ;;  %s1352_s9 = smov 111  }
  0xb4   : > { %454 = vrot.lane.b32.xlu1 %v1540_v1, %s2233_s14  ;;  %452 = vrot.lane.b32.xlu0 %v1533_v0, %s2233_s14  ;;  %s1353_s14 = smov 112  }
  0xb8   : > { %447 = vrot.lane.b32.xlu1 %v1540_v1, %s2235_s8  ;;  %445 = vrot.lane.b32.xlu0 %v1533_v0, %s2235_s8  ;;  %s1354_s8 = smov 113  }
  0xbc   : > { %440 = vrot.lane.b32.xlu1 %v1540_v1, %s1351_s10  ;;  %438 = vrot.lane.b32.xlu0 %v1533_v0, %s1351_s10 }
  0xc0   : > { %433 = vrot.lane.b32.xlu1 %v1540_v1, %s1352_s9  ;;  %431 = vrot.lane.b32.xlu0 %v1533_v0, %s1352_s9 }
  0xc4   : > { %426 = vrot.lane.b32.xlu1 %v1540_v1, %s1353_s14  ;;  %424 = vrot.lane.b32.xlu0 %v1533_v0, %s1353_s14 }
  0xc8   : > { %419 = vrot.lane.b32.xlu1 %v1540_v1, %s1354_s8  ;;  %417 = vrot.lane.b32.xlu0 %v1533_v0, %s1354_s8  ;;  %v1723_v1 = vld [vmem:[#allocation2 + $0x70] sm:$0xff] }
  0xde   : > { %v404_v5 = vpop.permute.xlu1 %403  ;;  %v411_v6 = vpop.permute.xlu0 %410 }
  0xe2   : > { %v406_v9 = vpop.permute.xlu1 %405  ;;  %v413_v10 = vpop.permute.xlu0 %412 }
  0xe3   : > { %v409_v12 = vsel %vm407_vm1, %v406_v9, %v404_v5  ;;  %v415_v13 = vsel %vm414_vm2, %v411_v6, %v413_v10  ;;  %v416_v14 = vsel %vm414_vm2, %v413_v10, %v411_v6  ;;  %v408_v16 = vsel %vm407_vm1, %v404_v5, %v406_v9 }
  0xe4   : > { %v511_v17 = vmul.f32 %v416_v14, %v1639_v7  ;;  %v510_v18 = vmul.f32 %v415_v13, %v1641_v8  ;;  %v509_v22 = vmul.f32 %v409_v12, %v1643_v11  ;;  %v508_v26 = vmul.f32 %v408_v16, %v1651_v15  ;;  %v1734_v13 = vld [vmem:[#allocation2 + $0x60] sm:$0xff]  ;;  %v1736_v14 = vld [vmem:[#allocation2 + $0x68] sm:$0xff] }
  0xe6   : > { %v399_v23 = vpop.permute.xlu1 %398  ;;  %543 = vmatprep.subr.mxu0 %v511_v17  ;;  %v397_v24 = vpop.permute.xlu0 %396 }
  0xe7   : > { %v401_v27 = vsel %vm400_vm3, %v397_v24, %v399_v23  ;;  %v402_v28 = vsel %vm400_vm3, %v399_v23, %v397_v24  ;;  %544 = vmatpush1.msra.mxu0 %v510_v18 }
  0xe8   : > { %v506_v29 = vmul.f32 %v401_v27, %v1658_v19  ;;  %v507_v30 = vmul.f32 %v402_v28, %v1660_v20  ;;  %545 = vmatprep.subr.mxu0 %v509_v22  ;;  %v1747_v27 = vld [vmem:[#allocation2 + $0x58] sm:$0xff] }
  0xe9   : > { %546 = vmatpush1.msra.mxu0 %v508_v26  ;;  %v1745_v26 = vld [vmem:[#allocation2 + $0x50] sm:$0xff] }
  0xea   : > { %v392_v35 = vpop.permute.xlu1 %391  ;;  %547 = vmatprep.subr.mxu0 %v507_v30  ;;  %v390_v36 = vpop.permute.xlu0 %389 }
  0xeb   : > { %v394_v37 = vsel %vm393_vm4, %v390_v36, %v392_v35  ;;  %v395_v38 = vsel %vm393_vm4, %v392_v35, %v390_v36  ;;  %548 = vmatpush1.msra.mxu0 %v506_v29  ;;  %v1756_v36 = vld [vmem:[#allocation2 + $0x40] sm:$0xff] }
  0xec   : > { %v502_v39 = vmul.f32 %v395_v38, %v1677_v32  ;;  %v503_v40 = vmul.f32 %v394_v37, %v1679_v33  ;;  %549 = vmatprep.subr.mxu0 %v505_v31  ;;  %v1758_v37 = vld [vmem:[#allocation2 + $0x48] sm:$0xff] }
  0xed   : > { %550 = vmatpush1.msra.mxu0 %v504_v34 }
  0xee   : > { %v385_v43 = vpop.permute.xlu1 %384  ;;  %v383_v44 = vpop.permute.xlu0 %382  ;;  %551 = vmatprep.subr.mxu0 %v503_v40 }
  0xef   : > { %v387_v45 = vsel %vm386_vm5, %v383_v44, %v385_v43  ;;  %v388_v46 = vsel %vm386_vm5, %v385_v43, %v383_v44  ;;  %552 = vmatpush1.msra.mxu0 %v502_v39 }
  0xf0   : > { %v500_v47 = vmul.f32 %v388_v46, %v1690_v41  ;;  %v501_v48 = vmul.f32 %v387_v45, %v1692_v42  ;;  %v1767_v46 = vld [vmem:[#allocation2 + $0x30] sm:$0xff] }
  0xf2   : > { %v378_v51 = vpop.permute.xlu1 %377  ;;  %v376_v52 = vpop.permute.xlu0 %375  ;;  %553 = vmatprep.subr.mxu0 %v501_v48 }
  0xf3   : > { %v380_v53 = vsel %vm379_vm6, %v376_v52, %v378_v51  ;;  %v381_v54 = vsel %vm379_vm6, %v378_v51, %v376_v52  ;;  %554 = vmatpush1.msra.mxu0 %v500_v47  ;;  %v1769_v47 = vld [vmem:[#allocation2 + $0x38] sm:$0xff] }
  0xf4   : > { %v498_v55 = vmul.f32 %v381_v54, %v1701_v49  ;;  %v499_v56 = vmul.f32 %v380_v53, %v1703_v50 }
  0xf6   : > { %v371_v59 = vpop.permute.xlu1 %370  ;;  %v369_v60 = vpop.permute.xlu0 %368  ;;  %555 = vmatprep.subr.mxu0 %v499_v56  ;;  %v1778_v56 = vld [vmem:[#allocation2 + $0x20] sm:$0xff] }
  0xf7   : > { %v373_v61 = vsel %vm372_vm7, %v369_v60, %v371_v59  ;;  %v374_v62 = vsel %vm372_vm7, %v371_v59, %v369_v60  ;;  %556 = vmatpush1.msra.mxu0 %v498_v55  ;;  %v1780_v59 = vld [vmem:[#allocation2 + $0x28] sm:$0xff] }
  0xf8   : > { %v496_v63 = vmul.f32 %v374_v62, %v1712_v57  ;;  %v497_v0 = vmul.f32 %v373_v61, %v1714_v58 }
  0xfa   : > { %v364_v3 = vpop.permute.xlu1 %363  ;;  %v362_v5 = vpop.permute.xlu0 %361  ;;  %557 = vmatprep.subr.mxu0 %v497_v0 }
  0xfb   : > { %v366_v6 = vsel %vm365_vm8, %v362_v5, %v364_v3  ;;  %v367_v9 = vsel %vm365_vm8, %v364_v3, %v362_v5  ;;  %558 = vmatpush1.msra.mxu0 %v496_v63  ;;  %v1789_v5 = vld [vmem:[#allocation2 + $0x10] sm:$0xff] }
  0xfc   : > { %v494_v10 = vmul.f32 %v367_v9, %v1723_v1  ;;  %v495_v12 = vmul.f32 %v366_v6, %v1725_v2  ;;  %v1791_v6 = vld [vmem:[#allocation2 + $0x18] sm:$0xff] }
  0xfe   : > { %v357_v16 = vpop.permute.xlu1 %356  ;;  %v355_v17 = vpop.permute.xlu0 %354  ;;  %559 = vmatprep.subr.mxu0 %v495_v12 }
  0xff   : > { %v359_v18 = vsel %vm358_vm9, %v355_v17, %v357_v16  ;;  %v360_v22 = vsel %vm358_vm9, %v357_v16, %v355_v17  ;;  %560 = vmatpush1.msra.mxu0 %v494_v10 }
 0x100   : > { %v492_v23 = vmul.f32 %v360_v22, %v1734_v13  ;;  %v493_v24 = vmul.f32 %v359_v18, %v1736_v14  ;;  %v1800_v22 = vld [vmem:[#allocation2] sm:$0xff] }
 0x102   : > { %v350_v28 = vpop.permute.xlu1 %349  ;;  %v348_v29 = vpop.permute.xlu0 %347  ;;  %561 = vmatprep.subr.mxu0 %v493_v24 }
 0x103   : > { %v352_v30 = vsel %vm351_vm10, %v348_v29, %v350_v28  ;;  %v353_v31 = vsel %vm351_vm10, %v350_v28, %v348_v29  ;;  %562 = vmatpush1.msra.mxu0 %v492_v23  ;;  %v1802_v23 = vld [vmem:[#allocation2 + $0x8] sm:$0xff] }
 0x104   : > { %v490_v34 = vmul.f32 %v353_v31, %v1745_v26  ;;  %v491_v35 = vmul.f32 %v352_v30, %v1747_v27 }
 0x106   : > { %v343_v38 = vpop.permute.xlu1 %342  ;;  %v341_v39 = vpop.permute.xlu0 %340  ;;  %563 = vmatprep.subr.mxu0 %v491_v35  ;;  %v1811_v35 = vld [vmem:[#allocation2 + $0x180] sm:$0xff] }
 0x107   : > { %v345_v40 = vsel %vm344_vm11, %v341_v39, %v343_v38  ;;  %v346_v43 = vsel %vm344_vm11, %v343_v38, %v341_v39  ;;  %564 = vmatpush1.msra.mxu0 %v490_v34  ;;  %v1813_v38 = vld [vmem:[#allocation2 + $0x188] sm:$0xff]  ;;  %v1815_v39 = vld [vmem:[#allocation2 + $0x198] sm:$0x1] }
 0x108   : > { %v488_v44 = vmul.f32 %v346_v43, %v1756_v36  ;;  %v489_v45 = vmul.f32 %v345_v40, %v1758_v37 }
 0x10a   : > { %v336_v48 = vpop.permute.xlu1 %335  ;;  %v334_v51 = vpop.permute.xlu0 %333  ;;  %565 = vmatprep.subr.mxu0 %v489_v45 }
 0x10b   : > { %v338_v52 = vsel %vm337_vm12, %v334_v51, %v336_v48  ;;  %v339_v53 = vsel %vm337_vm12, %v336_v48, %v334_v51  ;;  %566 = vmatpush1.msra.mxu0 %v488_v44  ;;  %v1817_v44 = vld [vmem:[#allocation2 + $0x190] sm:$0x1] }
 0x10c   : > { %v486_v54 = vmul.f32 %v339_v53, %v1767_v46  ;;  %v487_v55 = vmul.f32 %v338_v52, %v1769_v47  ;;  %v1830_v53 = vld [vmem:[#allocation2 + $0x170] sm:$0xff] }
 0x10e   : > { %v329_v60 = vpop.permute.xlu1 %328  ;;  %v327_v61 = vpop.permute.xlu0 %326  ;;  %567 = vmatprep.subr.mxu0 %v487_v55 }
 0x10f   : > { %v331_v62 = vsel %vm2238_vm13, %v327_v61, %v329_v60  ;;  %v332_v63 = vsel %vm2238_vm13, %v329_v60, %v327_v61  ;;  %568 = vmatpush1.msra.mxu0 %v486_v54  ;;  %vm2240_vm13 = vcmask 1040384   ;;  %v1832_v54 = vld [vmem:[#allocation2 + $0x178] sm:$0xff] }
 0x110   : > { %v484_v0 = vmul.f32 %v332_v63, %v1778_v56  ;;  %v485_v3 = vmul.f32 %v331_v62, %v1780_v59 }
 0x112   : > { %v322_v9 = vpop.permute.xlu1 %321  ;;  %v320_v10 = vpop.permute.xlu0 %319  ;;  %569 = vmatprep.subr.mxu0 %v485_v3  ;;  %v1841_v3 = vld [vmem:[#allocation2 + $0x160] sm:$0xff] }
 0x113   : > { %v324_v12 = vsel %vm2237_vm14, %v320_v10, %v322_v9  ;;  %v325_v16 = vsel %vm2237_vm14, %v322_v9, %v320_v10  ;;  %570 = vmatpush1.msra.mxu0 %v484_v0  ;;  %vm477_vm14 = vcmp.lt.s32.totalorder %v1635_v4, 94  ;;  %v1843_v9 = vld [vmem:[#allocation2 + $0x168] sm:$0xff] }
 0x114   : > { %v482_v17 = vmul.f32 %v325_v16, %v1789_v5  ;;  %v483_v18 = vmul.f32 %v324_v12, %v1791_v6 }
 0x116   : > { %v313_v24 = vpop.permute.xlu1 %312  ;;  %v311_v28 = vpop.permute.xlu0 %310  ;;  %571 = vmatprep.subr.mxu0 %v483_v18 }
 0x117   : > { %v317_v29 = vsel %vm2239_vm15, %v311_v28, %v313_v24  ;;  %v318_v30 = vsel %vm2239_vm15, %v313_v24, %v311_v28  ;;  %572 = vmatpush1.msra.mxu0 %v482_v17  ;;  %vm2241_vm15 = vcmp.lt.s32.totalorder %v1635_v4, 95  ;;  %v1852_v28 = vld [vmem:[#allocation2 + $0x150] sm:$0xff] }
 0x118   : > { %v480_v31 = vmul.f32 %v318_v30, %v1800_v22  ;;  %v481_v34 = vmul.f32 %v317_v29, %v1802_v23  ;;  %v1854_v29 = vld [vmem:[#allocation2 + $0x158] sm:$0xff] }
 0x11a   : > { %v476_v40 = vpop.permute.xlu1 %475  ;;  %v474_v43 = vpop.permute.xlu0 %473  ;;  %573 = vmatprep.subr.mxu0 %v481_v34 }
 0x11b   : > { %v478_v45 = vsel %vm477_vm14, %v474_v43, %v476_v40  ;;  %v479_v48 = vsel %vm477_vm14, %v476_v40, %v474_v43  ;;  %574 = vmatpush1.msra.mxu0 %v480_v31 }
 0x11c   : > { %v528_v51 = vmul.f32 %v478_v45, %v1811_v35  ;;  %v529_v52 = vmul.f32 %v479_v48, %v1813_v38  ;;  %1023 = vmatprep.subr.msk.mxu0 %vm2240_vm13, %v1815_v39  ;;  %v1863_v48 = vld [vmem:[#allocation2 + $0x140] sm:$0xff] }
 0x11d   : > { %1024 = vmatpush2.msk.msra.mxu0 %vm2240_vm13, %v1817_v44  ;;  %vm2242_vm13 = vcmp.lt.s32.totalorder %v1635_v4, 96 }
 0x11e   : > { %v469_v55 = vpop.permute.xlu1 %468  ;;  %v467_v60 = vpop.permute.xlu0 %466  ;;  %589 = vmatprep.subr.mxu0 %v529_v52 }
 0x11f   : > { %v471_v61 = vsel %vm2241_vm15, %v467_v60, %v469_v55  ;;  %v472_v62 = vsel %vm2241_vm15, %v469_v55, %v467_v60  ;;  %590 = vmatpush2.msra.mxu0 %v528_v51  ;;  %vm2243_vm15 = vcmp.lt.s32.totalorder %v1635_v4, 97  ;;  %v1865_v51 = vld [vmem:[#allocation2 + $0x148] sm:$0xff] }
 0x120   : > { %v526_v63 = vmul.f32 %v471_v61, %v1830_v53  ;;  %v527_v0 = vmul.f32 %v472_v62, %v1832_v54 }
 0x122   : > { %v462_v10 = vpop.permute.xlu1 %461  ;;  %v460_v12 = vpop.permute.xlu0 %459  ;;  %591 = vmatprep.subr.mxu0 %v527_v0  ;;  %v1874_v0 = vld [vmem:[#allocation2 + $0x130] sm:$0xff] }
 0x123   : > { %v464_v16 = vsel %vm2242_vm13, %v460_v12, %v462_v10  ;;  %v465_v17 = vsel %vm2242_vm13, %v462_v10, %v460_v12  ;;  %592 = vmatpush2.msra.mxu0 %v526_v63  ;;  %vm2244_vm13 = vcmp.lt.s32.totalorder %v1635_v4, 98  ;;  %v1876_v10 = vld [vmem:[#allocation2 + $0x138] sm:$0xff] }
 0x124   : > { %v524_v18 = vmul.f32 %v464_v16, %v1841_v3  ;;  %v525_v24 = vmul.f32 %v465_v17, %v1843_v9 }
 0x126   : > { %v455_v30 = vpop.permute.xlu1 %454  ;;  %v453_v31 = vpop.permute.xlu0 %452  ;;  %593 = vmatprep.subr.mxu0 %v525_v24 }
 0x127   : > { %v457_v34 = vsel %vm2243_vm15, %v453_v31, %v455_v30  ;;  %v458_v40 = vsel %vm2243_vm15, %v455_v30, %v453_v31  ;;  %594 = vmatpush2.msra.mxu0 %v524_v18  ;;  %vm2245_vm15 = vcmp.lt.s32.totalorder %v1635_v4, 110  ;;  %v1885_v31 = vld [vmem:[#allocation2 + $0x120] sm:$0xff] }
 0x128   : > { %v522_v43 = vmul.f32 %v457_v34, %v1852_v28  ;;  %v523_v45 = vmul.f32 %v458_v40, %v1854_v29  ;;  %v1887_v34 = vld [vmem:[#allocation2 + $0x128] sm:$0xff] }
 0x12a   : > { %v448_v52 = vpop.permute.xlu1 %447  ;;  %v446_v55 = vpop.permute.xlu0 %445  ;;  %595 = vmatprep.subr.mxu0 %v523_v45 }
 0x12b   : > { %v450_v60 = vsel %vm2244_vm13, %v446_v55, %v448_v52  ;;  %v451_v61 = vsel %vm2244_vm13, %v448_v52, %v446_v55  ;;  %596 = vmatpush2.msra.mxu0 %v522_v43  ;;  %vm2246_vm13 = vcmp.lt.s32.totalorder %v1635_v4, 111 }
 0x12c   : > { %v520_v62 = vmul.f32 %v450_v60, %v1863_v48  ;;  %v521_v63 = vmul.f32 %v451_v61, %v1865_v51  ;;  %v1896_v61 = vld [vmem:[#allocation2 + $0x110] sm:$0xff] }
 0x12d   : > { %2266 = vst [vmem:[#allocation16_spill] sm:$0xff] %v1896_v61 }
 0x12e   : > { %v441_v12 = vpop.permute.xlu1 %440  ;;  %v439_v16 = vpop.permute.xlu0 %438  ;;  %597 = vmatprep.subr.mxu0 %v521_v63 }
 0x12f   : > { %v443_v17 = vsel %vm2245_vm15, %v439_v16, %v441_v12  ;;  %v444_v18 = vsel %vm2245_vm15, %v441_v12, %v439_v16  ;;  %598 = vmatpush2.msra.mxu0 %v520_v62  ;;  %vm428_vm15 = vcmp.lt.s32.totalorder %v1635_v4, 112  ;;  %v1898_v62 = vld [vmem:[#allocation2 + $0x118] sm:$0xff] }
 0x130   : > { %v518_v24 = vmul.f32 %v443_v17, %v1874_v0  ;;  %v519_v30 = vmul.f32 %v444_v18, %v1876_v10  ;;  %2267 = vst [vmem:[#allocation17_spill] sm:$0xff] %v1898_v62 }
 0x132   : > { %v434_v40 = vpop.permute.xlu1 %433  ;;  %v432_v43 = vpop.permute.xlu0 %431  ;;  %599 = vmatprep.subr.mxu0 %v519_v30  ;;  %v1907_v30 = vld [vmem:[#allocation2 + $0x100] sm:$0xff] }
 0x133   : > { %v436_v45 = vsel %vm2246_vm13, %v432_v43, %v434_v40  ;;  %v437_v52 = vsel %vm2246_vm13, %v434_v40, %v432_v43  ;;  %600 = vmatpush2.msra.mxu0 %v518_v24  ;;  %vm421_vm13 = vcmp.lt.s32.totalorder %v1635_v4, 113  ;;  %2268 = vst [vmem:[#allocation18_spill] sm:$0xff] %v1907_v30  ;;  %v1909_v40 = vld [vmem:[#allocation2 + $0x108] sm:$0xff] }
 0x134   : > { %v516_v55 = vmul.f32 %v436_v45, %v1885_v31  ;;  %v517_v60 = vmul.f32 %v437_v52, %v1887_v34  ;;  %2269 = vst [vmem:[#allocation19_spill] sm:$0xff] %v1909_v40 }
 0x136   : > { %v427_v63 = vpop.permute.xlu1 %426  ;;  %v425_v12 = vpop.permute.xlu0 %424  ;;  %601 = vmatprep.subr.mxu0 %v517_v60 }
 0x137   : > { %v429_v16 = vsel %vm428_vm15, %v425_v12, %v427_v63  ;;  %v430_v17 = vsel %vm428_vm15, %v427_v63, %v425_v12  ;;  %602 = vmatpush2.msra.mxu0 %v516_v55  ;;  %v530_v12 = vld [vmem:[#allocation7] sm:$0xff] }
 0x138   : > { %v514_v18 = vmul.f32 %v429_v16, %v1896_v61  ;;  %v515_v24 = vmul.f32 %v430_v17, %v1898_v62 }
 0x13a   : > { %v420_v43 = vpop.permute.xlu1 %419  ;;  %v418_v45 = vpop.permute.xlu0 %417  ;;  %603 = vmatprep.subr.mxu0 %v515_v24 }
 0x13b   : > { %v422_v52 = vsel %vm421_vm13, %v418_v45, %v420_v43  ;;  %v423_v60 = vsel %vm421_vm13, %v420_v43, %v418_v45  ;;  %604 = vmatpush2.msra.mxu0 %v514_v18 }
 0x13c   : > { %v512_v55 = vmul.f32 %v422_v52, %v1907_v30  ;;  %v513_v63 = vmul.f32 %v423_v60, %v1909_v40 }
 0x13e   : > { %605 = vmatprep.subr.mxu0 %v513_v63 }
 0x13f   : > { %606 = vmatpush2.msra.mxu0 %v512_v55 }
 0x140   : > { %608 = vmatmul.mubr.f32.vlgmr.msra.gmra.mxu0 %v530_v12 }
 0x200   : > { %v609_v16 = vpop.f32.mrf.mxu0 }
 0x201   : > { %v1917_v17 = vmax.f32 %v609_v16, 0.0 }
 0x202   : > { %v611_v62 = vpop.f32.mrf.mxu0 }
 0x203   : > { %v1919_v24 = vmax.f32 %v611_v62, 0.0  ;;  %700 = vrot.lane.b32.xlu0 %v1917_v17, %s1332_s21  ;;  %v811_v62 = vld [vmem:[#allocation8 + $0x8] sm:$0xff] }
 0x204   : > { %1028 = vmatprep.mubr.msk.f32.mxu1 %vm532_vm0, %v811_v62  ;;  %vm2279_vm0 = vcmp.lt.s32.totalorder %v1635_v4, 32 }
 0x205   : > { %702 = vrot.lane.b32.xlu1 %v1919_v24, %s1332_s21  ;;  %s2271_s21 = smov 32  }
 0x207   : > { %694 = vrot.lane.b32.xlu0 %v1917_v17, %s1331_s23 }
 0x209   : > { %696 = vrot.lane.b32.xlu1 %v1919_v24, %s1331_s23  ;;  %s2270_s23 = smov 31  }
 0x20b   : > { %688 = vrot.lane.b32.xlu0 %v1917_v17, %s1333_s12 }
 0x20d   : > { %690 = vrot.lane.b32.xlu1 %v1919_v24, %s1333_s12  ;;  %s2272_s12 = smov 33  }
 0x20f   : > { %682 = vrot.lane.b32.xlu0 %v1917_v17, %s1334_s13 }
 0x211   : > { %684 = vrot.lane.b32.xlu1 %v1919_v24, %s1334_s13  ;;  %s2273_s13 = smov 34  }
 0x213   : > { %676 = vrot.lane.b32.xlu0 %v1917_v17, %s1335_s25 }
 0x215   : > { %678 = vrot.lane.b32.xlu1 %v1919_v24, %s1335_s25  ;;  %s2274_s25 = smov 94  }
 0x217   : > { %670 = vrot.lane.b32.xlu0 %v1917_v17, %s1336_s26 }
 0x219   : > { %672 = vrot.lane.b32.xlu1 %v1919_v24, %s1336_s26  ;;  %s2275_s26 = smov 95  }
 0x21b   : > { %664 = vrot.lane.b32.xlu0 %v1917_v17, %s1337_s5 }
 0x21d   : > { %666 = vrot.lane.b32.xlu1 %v1919_v24, %s1337_s5  ;;  %s2276_s5 = smov 96  }
 0x21f   : > { %658 = vrot.lane.b32.xlu0 %v1917_v17, %s1338_s30 }
 0x221   : > { %660 = vrot.lane.b32.xlu1 %v1919_v24, %s1338_s30  ;;  %s2277_s30 = smov 97  }
 0x223   : > { %652 = vrot.lane.b32.xlu0 %v1917_v17, %s1339_s6 }
 0x225   : > { %654 = vrot.lane.b32.xlu1 %v1919_v24, %s1339_s6  ;;  %s2278_s6 = smov 98  }
 0x227   : > { %646 = vrot.lane.b32.xlu0 %v1917_v17, %s1340_s29 }
 0x229   : > { %648 = vrot.lane.b32.xlu1 %v1919_v24, %s1340_s29  ;;  %s253_s29 = scalar_lea.vmem [#allocation10], %s1515_s20 }
 0x22b   : > { %640 = vrot.lane.b32.xlu0 %v1917_v17, %s1341_s7 }
 0x22d   : > { %642 = vrot.lane.b32.xlu1 %v1919_v24, %s1341_s7  ;;  %s907_s7 = sshll.u32 %s253_s29, 4  ;;  %s908_s7 = int_to_ptr.vmem [resolvable:$true] %s907_s7 }
 0x22f   : > { %634 = vrot.lane.b32.xlu0 %v1917_v17, %s2270_s23 }
 0x231   : > { %636 = vrot.lane.b32.xlu1 %v1919_v24, %s2270_s23  ;;  %s2303_s23 = sand.u32 1, %s1315_s16  }
 0x233   : > { %628 = vrot.lane.b32.xlu0 %v1917_v17, %s2271_s21 }
 0x235   : > { %630 = vrot.lane.b32.xlu1 %v1919_v24, %s2271_s21  ;;  %s893_s21 = scalar_lea.sflag [#allocation4], %s2303_s23 }
 0x237   : > { %622 = vrot.lane.b32.xlu0 %v1917_v17, %s2272_s12 }
 0x239   : > { %624 = vrot.lane.b32.xlu1 %v1919_v24, %s2272_s12  ;;  %s1247_s12 = scalar_lea.vmem %s908_s7, 256 }
 0x23a   : > { %p1248_p7 = scmp.ne.s32.totalorder %s908_s7, %s1247_s12 }
 0x23b   : > { %616 = vrot.lane.b32.xlu0 %v1917_v17, %s2273_s13 }
 0x23c   : > { %p1249_p13 = pnand %p1248_p7, %p2304_p10 }
 0x23d   : > { %618 = vrot.lane.b32.xlu1 %v1919_v24, %s2273_s13 }
 0x23e   : > { %p1250_p0 = pneg %p1249_p13 }
 0x23f   : > { %754 = vrot.lane.b32.xlu0 %v1917_v17, %s2274_s25 }
 0x241   : > { %756 = vrot.lane.b32.xlu1 %v1919_v24, %s2274_s25 }
 0x243   : > { %748 = vrot.lane.b32.xlu0 %v1917_v17, %s2275_s26 }
 0x245   : > { %750 = vrot.lane.b32.xlu1 %v1919_v24, %s2275_s26 }
 0x247   : > { %742 = vrot.lane.b32.xlu0 %v1917_v17, %s2276_s5 }
 0x249   : > { %744 = vrot.lane.b32.xlu1 %v1919_v24, %s2276_s5 }
 0x24b   : > { %736 = vrot.lane.b32.xlu0 %v1917_v17, %s2277_s30 }
 0x24d   : > { %738 = vrot.lane.b32.xlu1 %v1919_v24, %s2277_s30 }
 0x24f   : > { %730 = vrot.lane.b32.xlu0 %v1917_v17, %s2278_s6 }
 0x251   : > { %732 = vrot.lane.b32.xlu1 %v1919_v24, %s2278_s6 }
 0x253   : > { %724 = vrot.lane.b32.xlu0 %v1917_v17, %s1351_s10 }
 0x255   : > { %726 = vrot.lane.b32.xlu1 %v1919_v24, %s1351_s10 }
 0x257   : > { %718 = vrot.lane.b32.xlu0 %v1917_v17, %s1352_s9 }
 0x259   : > { %720 = vrot.lane.b32.xlu1 %v1919_v24, %s1352_s9 }
 0x25b   : > { %712 = vrot.lane.b32.xlu0 %v1917_v17, %s1353_s14 }
 0x25d   : > { %714 = vrot.lane.b32.xlu1 %v1919_v24, %s1353_s14  ;;  %s1035_s14 = sshll.u32 %s1402_s19, 8  ;;  %s1355_s19 = smov [#allocation10]  }
 0x25e   : > { %s905_s9 = scalar_lea.hbm %s2213_s4, %s1035_s14  ;;  %s1251_s20 = sshll.u32 %s1355_s19, 4  ;;  %s1252_s20 = int_to_ptr.vmem [resolvable:$false] %s1251_s20 }
 0x25f   : > { %706 = vrot.lane.b32.xlu0 %v1917_v17, %s1354_s8  ;;  %p1254_p1 = scmp.lt.s32.totalorder %s908_s7, %s1252_s20 }
 0x261   : > { %708 = vrot.lane.b32.xlu1 %v1919_v24, %s1354_s8 }
 0x275   : > { %v701_v18 = vpop.permute.xlu0 %700 }
 0x277   : > { %v703_v43 = vpop.permute.xlu1 %702 }
 0x278   : > { %v704_v45 = vsel %vm414_vm2, %v701_v18, %v703_v43  ;;  %v705_v52 = vsel %vm414_vm2, %v703_v43, %v701_v18  ;;  %vm2281_vm2 = vcmp.lt.s32.totalorder %v1635_v4, 33 }
 0x279   : > { %v695_v60 = vpop.permute.xlu0 %694  ;;  %v791_v55 = vmul.f32 %v705_v52, %v1639_v7  ;;  %v790_v63 = vmul.f32 %v704_v45, %v1641_v8 }
 0x27b   : > { %815 = vmatprep.subr.mxu1 %v791_v55  ;;  %v697_v12 = vpop.permute.xlu1 %696 }
 0x27c   : > { %v698_v16 = vsel %vm407_vm1, %v695_v60, %v697_v12  ;;  %v699_v62 = vsel %vm407_vm1, %v697_v12, %v695_v60  ;;  %816 = vmatpush1.msra.mxu1 %v790_v63  ;;  %vm2280_vm1 = vmmov %vm2279_vm0 }
 0x27d   : > { %v788_v40 = vmul.f32 %v698_v16, %v1651_v15  ;;  %v789_v30 = vmul.f32 %v699_v62, %v1643_v11  ;;  %v689_v61 = vpop.permute.xlu0 %688  ;;  %v785_v11 = vmul.f32 %v1919_v24, %v1662_v21 }
 0x27f   : > { %817 = vmatprep.subr.mxu1 %v789_v30  ;;  %v691_v18 = vpop.permute.xlu1 %690 }
 0x280   : > { %v692_v7 = vsel %vm400_vm3, %v689_v61, %v691_v18  ;;  %v693_v8 = vsel %vm400_vm3, %v691_v18, %v689_v61  ;;  %818 = vmatpush1.msra.mxu1 %v788_v40  ;;  %v784_v61 = vmul.f32 %v1917_v17, %v1665_v25  ;;  %vm2282_vm3 = vmmov %vm2281_vm2 }
 0x281   : > { %v786_v43 = vmul.f32 %v692_v7, %v1658_v19  ;;  %v787_v45 = vmul.f32 %v693_v8, %v1660_v20  ;;  %v683_v52 = vpop.permute.xlu0 %682 }
 0x283   : > { %819 = vmatprep.subr.mxu1 %v787_v45  ;;  %v685_v60 = vpop.permute.xlu1 %684 }
 0x284   : > { %v686_v15 = vsel %vm393_vm4, %v683_v52, %v685_v60  ;;  %v687_v30 = vsel %vm393_vm4, %v685_v60, %v683_v52  ;;  %820 = vmatpush1.msra.mxu1 %v786_v43  ;;  %vm2283_vm4 = vcmp.lt.s32.totalorder %v1635_v4, 34 }
 0x285   : > { %v782_v19 = vmul.f32 %v687_v30, %v1677_v32  ;;  %v783_v20 = vmul.f32 %v686_v15, %v1679_v33  ;;  %v677_v40 = vpop.permute.xlu0 %676  ;;  %821 = vmatprep.subr.mxu1 %v785_v11 }
 0x286   : > { %822 = vmatpush1.msra.mxu1 %v784_v61 }
 0x287   : > { %v679_v55 = vpop.permute.xlu1 %678  ;;  %823 = vmatprep.subr.mxu1 %v783_v20 }
 0x288   : > { %v680_v21 = vsel %vm386_vm5, %v677_v40, %v679_v55  ;;  %v681_v24 = vsel %vm386_vm5, %v679_v55, %v677_v40  ;;  %824 = vmatpush1.msra.mxu1 %v782_v19  ;;  %vm2284_vm5 = vmmov %vm2283_vm4 }
 0x289   : > { %v780_v63 = vmul.f32 %v681_v24, %v1690_v41  ;;  %v781_v25 = vmul.f32 %v680_v21, %v1692_v42  ;;  %v671_v17 = vpop.permute.xlu0 %670 }
 0x28b   : > { %v673_v32 = vpop.permute.xlu1 %672  ;;  %825 = vmatprep.subr.mxu1 %v781_v25 }
 0x28c   : > { %v674_v33 = vsel %vm379_vm6, %v671_v17, %v673_v32  ;;  %v675_v12 = vsel %vm379_vm6, %v673_v32, %v671_v17  ;;  %826 = vmatpush1.msra.mxu1 %v780_v63  ;;  %vm2285_vm6 = vcmask 1040384  }
 0x28d   : > { %v778_v16 = vmul.f32 %v675_v12, %v1701_v49  ;;  %v779_v62 = vmul.f32 %v674_v33, %v1703_v50  ;;  %v665_v18 = vpop.permute.xlu0 %664 }
 0x28f   : > { %v667_v7 = vpop.permute.xlu1 %666  ;;  %827 = vmatprep.subr.mxu1 %v779_v62 }
 0x290   : > { %v668_v41 = vsel %vm372_vm7, %v665_v18, %v667_v7  ;;  %v669_v42 = vsel %vm372_vm7, %v667_v7, %v665_v18  ;;  %828 = vmatpush1.msra.mxu1 %v778_v16  ;;  %vm2286_vm7 = vmmov %vm2285_vm6 }
 0x291   : > { %v776_v8 = vmul.f32 %v669_v42, %v1712_v57  ;;  %v777_v43 = vmul.f32 %v668_v41, %v1714_v58  ;;  %v659_v45 = vpop.permute.xlu0 %658 }
 0x293   : > { %v661_v52 = vpop.permute.xlu1 %660  ;;  %829 = vmatprep.subr.mxu1 %v777_v43 }
 0x294   : > { %v662_v49 = vsel %vm365_vm8, %v659_v45, %v661_v52  ;;  %v663_v50 = vsel %vm365_vm8, %v661_v52, %v659_v45  ;;  %830 = vmatpush1.msra.mxu1 %v776_v8  ;;  %vm2287_vm8 = vcmp.lt.s32.totalorder %v1635_v4, 95 }
 0x295   : > { %v774_v60 = vmul.f32 %v663_v50, %v1723_v1  ;;  %v775_v11 = vmul.f32 %v662_v49, %v1725_v2  ;;  %v653_v15 = vpop.permute.xlu0 %652 }
 0x297   : > { %v655_v30 = vpop.permute.xlu1 %654  ;;  %831 = vmatprep.subr.mxu1 %v775_v11 }
 0x298   : > { %v656_v57 = vsel %vm358_vm9, %v653_v15, %v655_v30  ;;  %v657_v58 = vsel %vm358_vm9, %v655_v30, %v653_v15  ;;  %832 = vmatpush1.msra.mxu1 %v774_v60  ;;  %vm2288_vm9 = vmmov %vm2287_vm8 }
 0x299   : > { %v772_v61 = vmul.f32 %v657_v58, %v1734_v13  ;;  %v773_v19 = vmul.f32 %v656_v57, %v1736_v14  ;;  %v647_v20 = vpop.permute.xlu0 %646 }
 0x29b   : > { %v649_v40 = vpop.permute.xlu1 %648  ;;  %833 = vmatprep.subr.mxu1 %v773_v19 }
 0x29c   : > { %v650_v1 = vsel %vm351_vm10, %v647_v20, %v649_v40  ;;  %v651_v2 = vsel %vm351_vm10, %v649_v40, %v647_v20  ;;  %834 = vmatpush1.msra.mxu1 %v772_v61  ;;  %vm2289_vm10 = vcmp.lt.s32.totalorder %v1635_v4, 96 }
 0x29d   : > { %v770_v55 = vmul.f32 %v651_v2, %v1745_v26  ;;  %v771_v21 = vmul.f32 %v650_v1, %v1747_v27  ;;  %v641_v24 = vpop.permute.xlu0 %640 }
 0x29f   : > { %v643_v63 = vpop.permute.xlu1 %642  ;;  %835 = vmatprep.subr.mxu1 %v771_v21 }
 0x2a0   : > { %v644_v13 = vsel %vm344_vm11, %v641_v24, %v643_v63  ;;  %v645_v14 = vsel %vm344_vm11, %v643_v63, %v641_v24  ;;  %836 = vmatpush1.msra.mxu1 %v770_v55  ;;  %vm2290_vm11 = vmmov %vm2289_vm10 }
 0x2a1   : > { %v768_v25 = vmul.f32 %v645_v14, %v1756_v36  ;;  %v769_v17 = vmul.f32 %v644_v13, %v1758_v37  ;;  %v635_v32 = vpop.permute.xlu0 %634 }
 0x2a3   : > { %v637_v33 = vpop.permute.xlu1 %636  ;;  %837 = vmatprep.subr.mxu1 %v769_v17 }
 0x2a4   : > { %v638_v26 = vsel %vm337_vm12, %v635_v32, %v637_v33  ;;  %v639_v27 = vsel %vm337_vm12, %v637_v33, %v635_v32  ;;  %838 = vmatpush1.msra.mxu1 %v768_v25  ;;  %vm2291_vm12 = vcmp.lt.s32.totalorder %v1635_v4, 97 }
 0x2a5   : > { %v766_v12 = vmul.f32 %v639_v27, %v1767_v46  ;;  %v767_v16 = vmul.f32 %v638_v26, %v1769_v47  ;;  %v629_v62 = vpop.permute.xlu0 %628 }
 0x2a7   : > { %v631_v18 = vpop.permute.xlu1 %630  ;;  %839 = vmatprep.subr.mxu1 %v767_v16 }
 0x2a8   : > { %v632_v36 = vsel %vm2279_vm0, %v629_v62, %v631_v18  ;;  %v633_v37 = vsel %vm2280_vm1, %v631_v18, %v629_v62  ;;  %840 = vmatpush1.msra.mxu1 %v766_v12  ;;  %vm2293_vm0 = vcmp.lt.s32.totalorder %v1635_v4, 98 }
 0x2a9   : > { %v764_v7 = vmul.f32 %v633_v37, %v1778_v56  ;;  %v765_v41 = vmul.f32 %v632_v36, %v1780_v59  ;;  %v623_v42 = vpop.permute.xlu0 %622  ;;  %vm2294_vm1 = vmmov %vm2293_vm0  ;;  %v2299_v37 = vld [vmem:[#allocation16_spill] sm:$0xff] }
 0x2ab   : > { %v625_v8 = vpop.permute.xlu1 %624  ;;  %841 = vmatprep.subr.mxu1 %v765_v41  ;;  %v2300_v41 = vld [vmem:[#allocation17_spill] sm:$0xff] }
 0x2ac   : > { %v626_v46 = vsel %vm2281_vm2, %v623_v42, %v625_v8  ;;  %v627_v47 = vsel %vm2282_vm3, %v625_v8, %v623_v42  ;;  %842 = vmatpush1.msra.mxu1 %v764_v7  ;;  %vm2295_vm2 = vcmp.lt.s32.totalorder %v1635_v4, 110 }
 0x2ad   : > { %v762_v43 = vmul.f32 %v627_v47, %v1789_v5  ;;  %v763_v45 = vmul.f32 %v626_v46, %v1791_v6  ;;  %v617_v52 = vpop.permute.xlu0 %616  ;;  %vm2296_vm3 = vmmov %vm2295_vm2  ;;  %v2301_v47 = vld [vmem:[#allocation18_spill] sm:$0xff] }
 0x2af   : > { %v619_v49 = vpop.permute.xlu1 %618  ;;  %843 = vmatprep.subr.mxu1 %v763_v45  ;;  %v2302_v45 = vld [vmem:[#allocation19_spill] sm:$0xff] }
 0x2b0   : > { %v620_v56 = vsel %vm2283_vm4, %v617_v52, %v619_v49  ;;  %v621_v59 = vsel %vm2284_vm5, %v619_v49, %v617_v52  ;;  %844 = vmatpush1.msra.mxu1 %v762_v43  ;;  %vm2297_vm4 = vcmp.lt.s32.totalorder %v1635_v4, 111  ;;  %v810_v49 = vld [vmem:[#allocation8] sm:$0xff] }
 0x2b1   : > { %v760_v50 = vmul.f32 %v621_v59, %v1800_v22  ;;  %v761_v60 = vmul.f32 %v620_v56, %v1802_v23  ;;  %v755_v11 = vpop.permute.xlu0 %754  ;;  %vm2298_vm5 = vmmov %vm2297_vm4  ;;  %v1139_v59 = vld [vmem:[%s1518_s11] sm:$0xff] }
 0x2b3   : > { %v757_v15 = vpop.permute.xlu1 %756  ;;  %845 = vmatprep.subr.mxu1 %v761_v60 }
 0x2b4   : > { %v758_v5 = vsel %vm477_vm14, %v755_v11, %v757_v15  ;;  %v759_v6 = vsel %vm477_vm14, %v757_v15, %v755_v11  ;;  %846 = vmatpush1.msra.mxu1 %v760_v50  ;;  %vm2292_vm14 = vmmov %vm2291_vm12  ;;  %v1140_v11 = vld [vmem:[%s1518_s11 + $0x8] sm:$0xff]  ;;  %s1253_s11 = scalar_lea.vmem %s1252_s20, 512 }
 0x2b5   : > { %v808_v30 = vmul.f32 %v758_v5, %v1811_v35  ;;  %v809_v57 = vmul.f32 %v759_v6, %v1813_v38  ;;  %v749_v58 = vpop.permute.xlu0 %748  ;;  %1026 = vmatprep.subr.msk.mxu1 %vm2285_vm6, %v1815_v39  ;;  %p1255_p3 = scmp.lt.s32.totalorder %s1253_s11, %s1247_s12 }
 0x2b6   : > { %1027 = vmatpush2.msk.msra.mxu1 %vm2286_vm7, %v1817_v44 }
 0x2b7   : > { %v751_v22 = vpop.permute.xlu1 %750  ;;  %861 = vmatprep.subr.mxu1 %v809_v57  ;;  %p1256_p5 = por %p1255_p3, %p1254_p1 }
 0x2b8   : > { %v752_v23 = vsel %vm2287_vm8, %v749_v58, %v751_v22  ;;  %v753_v61 = vsel %vm2288_vm9, %v751_v22, %v749_v58  ;;  %862 = vmatpush2.msra.mxu1 %v808_v30 }
 0x2b9   : > { %v806_v35 = vmul.f32 %v752_v23, %v1830_v53  ;;  %v807_v38 = vmul.f32 %v753_v61, %v1832_v54  ;;  %v743_v19 = vpop.permute.xlu0 %742  ;;  %p1257_p4 = pnand %p1256_p5, %p1250_p0 }
 0x2bb   : > { %v745_v20 = vpop.permute.xlu1 %744  ;;  %863 = vmatprep.subr.mxu1 %v807_v38 }
 0x2bc   : > { %v746_v39 = vsel %vm2289_vm10, %v743_v19, %v745_v20  ;;  %v747_v44 = vsel %vm2290_vm11, %v745_v20, %v743_v19  ;;  %864 = vmatpush2.msra.mxu1 %v806_v35 }
 0x2bd   : > { %v804_v40 = vmul.f32 %v746_v39, %v1841_v3  ;;  %v805_v1 = vmul.f32 %v747_v44, %v1843_v9  ;;  %v737_v2 = vpop.permute.xlu0 %736 }
 0x2bf   : > { %v739_v55 = vpop.permute.xlu1 %738  ;;  %865 = vmatprep.subr.mxu1 %v805_v1 }
 0x2c0   : > { %v740_v53 = vsel %vm2291_vm12, %v737_v2, %v739_v55  ;;  %v741_v54 = vsel %vm2292_vm14, %v739_v55, %v737_v2  ;;  %866 = vmatpush2.msra.mxu1 %v804_v40 }
 0x2c1   : > { %v802_v21 = vmul.f32 %v740_v53, %v1852_v28  ;;  %v803_v24 = vmul.f32 %v741_v54, %v1854_v29  ;;  %v731_v63 = vpop.permute.xlu0 %730 }
 0x2c3   : > { %v733_v13 = vpop.permute.xlu1 %732  ;;  %867 = vmatprep.subr.mxu1 %v803_v24 }
 0x2c4   : > { %v734_v3 = vsel %vm2293_vm0, %v731_v63, %v733_v13  ;;  %v735_v9 = vsel %vm2294_vm1, %v733_v13, %v731_v63  ;;  %868 = vmatpush2.msra.mxu1 %v802_v21 }
 0x2c5   : > { %v800_v14 = vmul.f32 %v734_v3, %v1863_v48  ;;  %v801_v25 = vmul.f32 %v735_v9, %v1865_v51  ;;  %v725_v17 = vpop.permute.xlu0 %724 }
 0x2c7   : > { %v727_v32 = vpop.permute.xlu1 %726  ;;  %869 = vmatprep.subr.mxu1 %v801_v25 }
 0x2c8   : > { %v728_v28 = vsel %vm2295_vm2, %v725_v17, %v727_v32  ;;  %v729_v29 = vsel %vm2296_vm3, %v727_v32, %v725_v17  ;;  %870 = vmatpush2.msra.mxu1 %v800_v14 }
 0x2c9   : > { %v798_v33 = vmul.f32 %v728_v28, %v1874_v0  ;;  %v799_v26 = vmul.f32 %v729_v29, %v1876_v10  ;;  %v719_v27 = vpop.permute.xlu0 %718 }
 0x2cb   : > { %v721_v12 = vpop.permute.xlu1 %720  ;;  %871 = vmatprep.subr.mxu1 %v799_v26 }
 0x2cc   : > { %v722_v48 = vsel %vm2297_vm4, %v719_v27, %v721_v12  ;;  %v723_v51 = vsel %vm2298_vm5, %v721_v12, %v719_v27  ;;  %872 = vmatpush2.msra.mxu1 %v798_v33 }
 0x2cd   : > { %v796_v16 = vmul.f32 %v722_v48, %v1885_v31  ;;  %v797_v62 = vmul.f32 %v723_v51, %v1887_v34  ;;  %v713_v18 = vpop.permute.xlu0 %712 }
 0x2cf   : > { %v715_v36 = vpop.permute.xlu1 %714  ;;  %873 = vmatprep.subr.mxu1 %v797_v62 }
 0x2d0   : > { %v716_v0 = vsel %vm428_vm15, %v713_v18, %v715_v36  ;;  %v717_v10 = vsel %vm428_vm15, %v715_v36, %v713_v18  ;;  %874 = vmatpush2.msra.mxu1 %v796_v16 }
 0x2d1   : > { %v794_v7 = vmul.f32 %v716_v0, %v2299_v37  ;;  %v795_v42 = vmul.f32 %v717_v10, %v2300_v41  ;;  %v707_v8 = vpop.permute.xlu0 %706 }
 0x2d3   : > { %v709_v31 = vpop.permute.xlu1 %708  ;;  %875 = vmatprep.subr.mxu1 %v795_v42 }
 0x2d4   : > { %v710_v34 = vsel %vm421_vm13, %v707_v8, %v709_v31  ;;  %v711_v46 = vsel %vm421_vm13, %v709_v31, %v707_v8  ;;  %876 = vmatpush2.msra.mxu1 %v794_v7 }
 0x2d5   : > { %v792_v43 = vmul.f32 %v710_v34, %v2301_v47  ;;  %v793_v52 = vmul.f32 %v711_v46, %v2302_v45 }
 0x2d7   : > { %877 = vmatprep.subr.mxu1 %v793_v52 }
 0x2d8   : > { %878 = vmatpush2.msra.mxu1 %v792_v43 }
 0x2d9   : > { %880 = vmatmul.mubr.f32.vlgmr.msra.gmra.mxu1 %v810_v49 }
 0x399   : > { %v881_v56 = vpop.f32.mrf.mxu1 }
 0x39a   : > { %v886_v50 = vadd.f32 %v1139_v59, %v881_v56 }
 0x39b   : > { %v883_v60 = vpop.f32.mrf.mxu1 }
 0x39c   : > { %v888_v4 = vmax.f32 %v886_v50, 0.0  ;;  %v887_v15 = vadd.f32 %v1140_v11, %v883_v60 }
 0x39e   : > { %890 = vst [vmem:[%s253_s29] sm:$0xff] %v888_v4  ;;  %v889_v5 = vmax.f32 %v887_v15, 0.0 }
 0x3a0   : > { %891 = vst [vmem:[%s253_s29 + $0x8] sm:$0xff] %v889_v5 }
 0x3a1   : > { %1260 = shalt.err (!%p1257_p4)
}
 0x3a2   : > { %s1261_s13 = scalar_lea.hbm %s905_s9, 256  ;;  %s1265_s5 = scalar_lea.hbm %s2213_s4, 512 }
 0x3a3   : > { %p1262_p2 = scmp.ne.s32.totalorder %s905_s9, %s1261_s13  ;;  %p1266_p6 = scmp.lt.s32.totalorder %s905_s9, %s2213_s4 }
 0x3a4   : > { %p1267_p8 = scmp.lt.s32.totalorder %s1265_s5, %s1261_s13 }
 0x3a5   : > { %p1263_p9 = pnand %p1262_p2, %p2304_p10 }
 0x3a6   : > { %p1268_p12 = por %p1267_p8, %p1266_p6 }
 0x3a7   : > { %p1264_p11 = pneg %p1263_p9 }
 0x3a9   : > { %p1269_p7 = pnand %p1268_p12, %p1264_p11 }
 0x3ab   : > { %1272 = shalt.err (!%p1269_p7)
}
 0x3ac   : > { %1050 = dma.vmem_to_hbm [thread:$0]  (%p2304_p10), %s908_s7, 256, %s905_s9, %s893_s21  }
 0x3ad PF: > { %s919_s14 = sand.u32 1, %s1311_s15   ;;  %p2305_p13 = scmp.ne.s32.totalorder %s2252_s22, 0 }
 0x3ae   : > { %p2306_p0 = scmp.ge.s32.totalorder %s1323_s18, 2  ;;  %s920_s29 = scalar_lea.sflag [#allocation4], %s919_s14 }
 0x3b0   : > { %p1067_p1 = pnand %p2306_p0, %p2305_p13 }
 0x3b2   : > { %p1068_p3 = pneg %p1067_p1 }
 0x3b4   : > { %1306 = dma.done.wait (%p1068_p3), %s920_s29, 256  }
 0x3b5   : > { %1308 = vsyncadd (%p1068_p3), %s920_s29, 4294967040  ;;  %p19_p5 = scmp.ge.s32.totalorder %s1461_s24, 4   ;;  %s2307_s15 = smov %s1315_s16 }
 0x3b6   : > { %s2308_s16 = smov %s1319_s17  ;;  %s2309_s17 = smov %s1471_s27 }
 0x3b7   : > { %s2310_s18 = smov %s1461_s24  ;;  %21 = sbr.rel (!%p19_p5) target bundleno = 7 (0x7), region = 94 }
 0x3bc   :  { %925 = vsyncpa [#allocation3], 1 }
 0x3bd   :  { %927 = vsyncpa [#allocation3 + $0x1], 1 }
 0x3be   :  { %928 = vsyncpa [#allocation6], 1 }
 0x3bf   :  { %930 = vsyncpa [#allocation6 + $0x1], 1 }
 0x3c0   :  { %931 = vsyncpa [#allocation9], 1 }
 0x3c1   :  { %932 = vsyncpa [#allocation4], 1 }
 0x3c2   :  { %934 = vsyncpa [#allocation4 + $0x1], 1 }

</bundles_post_ra>
